<compile_context>
chip_gen: v7x
topology: tpu7x:2x2x1
jax: 0.10.0
libtpu: 0.0.40
codegen_flags: <defaults>
</compile_context>

<pallas_src>
import functools
import math

import jax
import jax.numpy as jnp
from jax.experimental import pallas as pl
from jax.experimental.pallas import tpu as pltpu


# ----------------------------------------------------------------------------
# Pallas kernels
# ----------------------------------------------------------------------------

def _fused_gram_kernel(bi_ref, bj_ref,
                       xr_ref, xc_ref, yr_ref, yc_ref,
                       sqxr_ref, sqxc_ref, sqyr_ref, sqyc_ref,
                       kx_ref, ky_ref, kxy_ref,
                       *, neg_inv_two_sigma_sq, tile):
    """One upper-triangular (TILE, TILE) tile of Kx, Ky and Kxy = Kx * Ky.

    Only diagonal tiles (i == j) pay for the diag-forcing mask (K_ii = 1 so
    trace(K) == N exactly); interior tiles are pure dot -> dist -> exp.
    Padded rows/cols are NOT masked here: they are zero-filled inputs and are
    sliced away in the wrapper before eigh.
    """
    g = pl.program_id(0)
    i = bi_ref[g]
    j = bj_ref[g]

    scale = jnp.float32(neg_inv_two_sigma_sq)

    def gram(r_ref, c_ref, sqr_ref, sqc_ref):
        r = r_ref[...].astype(jnp.float32)                       # (T, D)
        c = c_ref[...].astype(jnp.float32)                       # (T, D)
        # r @ c.T on the MXU (contract the feature dim, no explicit transpose).
        gmm = jax.lax.dot_general(r, c, (((1,), (1,)), ((), ())),
                                  preferred_element_type=jnp.float32)  # (T, T)
        # precomputed squared norms: (T,1) + (1,T) broadcast, no XLU transpose.
        dist = jnp.maximum(sqr_ref[...] + sqc_ref[...] - 2.0 * gmm, 0.0)
        return jnp.exp(dist * scale)                             # EUP

    kx_ref[...] = gram(xr_ref, xc_ref, sqxr_ref, sqxc_ref)
    ky_ref[...] = gram(yr_ref, yc_ref, sqyr_ref, sqyc_ref)

    @pl.when(i == j)
    def _():
        rows = jax.lax.broadcasted_iota(jnp.int32, (tile, 1), 0)
        cols = jax.lax.broadcasted_iota(jnp.int32, (1, tile), 1)
        on_diag = rows == cols                                   # (T, T) via broadcast
        kx_ref[...] = jnp.where(on_diag, 1.0, kx_ref[...])
        ky_ref[...] = jnp.where(on_diag, 1.0, ky_ref[...])

    kxy_ref[...] = kx_ref[...] * ky_ref[...]


def _renyi_entropy_kernel(e_ref, h_ref, *, alpha, scale):
    """Batched Renyi entropy from eigenvalues.

    e_ref: (B, N) eigenvalues of the *un-normalized* Grams; `scale` = 1/N
    applies the trace normalization (trace == N because diag was forced to 1).
    h_ref: (B, 1) entropies = 1/(1-alpha) * log2(sum |e/N|^alpha).
    """
    e = jnp.abs(e_ref[...].astype(jnp.float32)) * jnp.float32(scale)     # (B, N)
    # |e|^alpha = exp(alpha * log|e|), explicit zero branch for zero eigs.
    logp = jnp.float32(alpha) * jnp.log(jnp.maximum(e, jnp.float32(1e-37)))
    pw = jnp.where(e > 0.0, jnp.exp(logp), 0.0)
    s = jnp.sum(pw, axis=1, keepdims=True)                               # (B, 1)
    inv_log2 = jnp.float32(1.0 / math.log(2.0))
    h_ref[...] = jnp.float32(1.0 / (1.0 - alpha)) * jnp.log(s) * inv_log2


# ----------------------------------------------------------------------------
# Wrappers
# ----------------------------------------------------------------------------

def _round_up(n, m):
    return ((n + m - 1) // m) * m


def _pick_tile_and_pad(n, max_tile=512):
    """Largest tile in {512, 256, 128} whose extra padding stays < ~15%."""
    base = _round_up(max(n, 1), 128)
    limit = int(base * 1.15)
    for t in (512, 256, 128):
        if t > max_tile:
            continue
        pad = _round_up(max(n, 1), t)
        if pad <= limit:
            return t, pad
    return 128, base


def _pad_rows(a, n_pad):
    n = a.shape[0]
    if n == n_pad:
        return a
    return jnp.pad(a, ((0, n_pad - n), (0, 0)))


def _vmem_limit_bytes():
    """Generation-aware scoped VMEM limit (v5e/v6e: 128 MiB physical -> 64 MiB;
    v7x: 64 MiB physical -> 40 MiB)."""
    try:
        cap = int(pltpu.get_tpu_info().vmem_capacity_bytes)
    except Exception:
        cap = 64 * 1024 * 1024
    return 64 * 1024 * 1024 if cap >= 100 * 1024 * 1024 else 40 * 1024 * 1024


def fused_rbf_grams(x_pad, y_pad, sigma, tile):
    """Returns (Kx, Ky, Kx*Ky), each (n_pad, n_pad) f32.

    Only the upper-triangular tile blocks are computed/written; everything
    below the block diagonal is left untouched (the caller mirrors it).
    """
    n_pad, dx = x_pad.shape
    dy = y_pad.shape[1]
    assert n_pad % tile == 0 and tile % 128 == 0
    nb = n_pad // tile

    # Upper-triangular block-index pairs, scalar-prefetched into SMEM.
    pairs = [(bi, bj) for bi in range(nb) for bj in range(bi, nb)]
    blk_i = jnp.asarray([p[0] for p in pairs], dtype=jnp.int32)
    blk_j = jnp.asarray([p[1] for p in pairs], dtype=jnp.int32)

    # Per-sample squared norms precomputed once (tiny O(N*D) work in plain JAX).
    sqx = jnp.sum(x_pad * x_pad, axis=1)
    sqy = jnp.sum(y_pad * y_pad, axis=1)

    row_map = lambda g, bi, bj: (bi[g], 0)
    col_map = lambda g, bi, bj: (bj[g], 0)
    sq_col_map = lambda g, bi, bj: (0, bj[g])
    out_map = lambda g, bi, bj: (bi[g], bj[g])
    out_spec = pl.BlockSpec((tile, tile), out_map)

    kernel = functools.partial(
        _fused_gram_kernel,
        neg_inv_two_sigma_sq=-1.0 / (2.0 * float(sigma) * float(sigma)),
        tile=tile)

    return pl.pallas_call(
        kernel,
        grid_spec=pltpu.PrefetchScalarGridSpec(
            num_scalar_prefetch=2,
            grid=(len(pairs),),
            in_specs=[
                pl.BlockSpec((tile, dx), row_map),      # x row tile
                pl.BlockSpec((tile, dx), col_map),      # x col tile
                pl.BlockSpec((tile, dy), row_map),      # y row tile
                pl.BlockSpec((tile, dy), col_map),      # y col tile
                pl.BlockSpec((tile, 1), row_map),       # |x|^2 rows
                pl.BlockSpec((1, tile), sq_col_map),    # |x|^2 cols
                pl.BlockSpec((tile, 1), row_map),       # |y|^2 rows
                pl.BlockSpec((1, tile), sq_col_map),    # |y|^2 cols
            ],
            out_specs=(out_spec, out_spec, out_spec),
        ),
        out_shape=(
            jax.ShapeDtypeStruct((n_pad, n_pad), jnp.float32),
            jax.ShapeDtypeStruct((n_pad, n_pad), jnp.float32),
            jax.ShapeDtypeStruct((n_pad, n_pad), jnp.float32),
        ),
        compiler_params=pltpu.CompilerParams(
            dimension_semantics=("parallel",),          # v7x: split across both TCs
            vmem_limit_bytes=_vmem_limit_bytes()),
    )(blk_i, blk_j, x_pad, x_pad, y_pad, y_pad,
      sqx.reshape(n_pad, 1), sqx.reshape(1, n_pad),
      sqy.reshape(n_pad, 1), sqy.reshape(1, n_pad))


def renyi_entropies(evals, alpha, scale):
    """evals: (B, N) eigenvalue rows -> (B,) Renyi entropies (one launch)."""
    b = evals.shape[0]
    vmem = pltpu.MemorySpace.VMEM
    h = pl.pallas_call(
        functools.partial(_renyi_entropy_kernel, alpha=float(alpha),
                          scale=float(scale)),
        in_specs=[pl.BlockSpec(memory_space=vmem)],
        out_specs=pl.BlockSpec(memory_space=vmem),
        out_shape=jax.ShapeDtypeStruct((b, 1), jnp.float32),
    )(evals.astype(jnp.float32))
    return h[:, 0]


class MetricRenyiPallas:
    """Pallas/JAX port of hal.losses.dependence.renyi.MetricRenyi."""

    def __init__(self, sigma=1.0, type_="marginal", alpha=1.01, normalize=True,
                 max_tile=512):
        self.sigma = float(sigma)
        self.type = type_
        self.alpha = float(alpha)
        self.normalize = bool(normalize)
        self.max_tile = int(max_tile)

    def __call__(self, inputs, target, sensitive):
        if self.type == "conditional":
            # TODO(synk): data-dependent row selection (target == 1) has no
            # static-shape Pallas equivalent; done eagerly in plain JAX.
            mask = target == 1
            inputs = inputs[mask]
            sensitive = sensitive[mask]

        # NOTE: n / tile / scale are baked in statically, so each distinct N
        # recompiles the Pallas kernels (perf trap, not a correctness bug).
        n = int(inputs.shape[0])
        tile, n_pad = _pick_tile_and_pad(n, self.max_tile)

        xp = _pad_rows(inputs.astype(jnp.float32), n_pad)
        yp = _pad_rows(sensitive.astype(jnp.float32), n_pad)

        # Fused upper-triangular tiled pass: Kx, Ky, Kxy (diag forced to 1).
        kx, ky, kxy = fused_rbf_grams(xp, yp, self.sigma, tile=tile)

        # Slice away padding BEFORE the O(N^3) eigh, then mirror the computed
        # upper triangle into the (never-written) lower triangle.
        ks = jnp.stack([kx[:n, :n], ky[:n, :n], kxy[:n, :n]], axis=0)
        ks = jnp.triu(ks) + jnp.swapaxes(jnp.triu(ks, 1), -1, -2)

        # TODO(synk): symmetric eigendecomposition (torch.symeig) has no Pallas
        # equivalent; batched eigenvalues via jnp.linalg.eigh in plain JAX.
        evals = jnp.linalg.eigh(ks)[0]                             # (3, n)

        # Trace normalization folded in as scale = 1/n (trace == n exactly).
        h = renyi_entropies(evals, self.alpha, scale=1.0 / n)      # (3,)
        hx, hy, hxy = h[0], h[1], h[2]
        ixy = hx + hy - hxy
        if self.normalize:
            ixy = ixy / jnp.maximum(hx, hy)
        return ixy


# ----------------------------------------------------------------------------
# Pure-JAX reference (correctness sanity check)
# ----------------------------------------------------------------------------

def _reference(inputs, target, sensitive, sigma, alpha, normalize):
    def gram(x):
        sq = jnp.sum(x * x, axis=1, keepdims=True)
        d = jnp.maximum(sq + sq.T - 2.0 * (x @ x.T), 0.0)
        return jnp.exp(-d / (2.0 * sigma * sigma))

    def ent(k):
        k = k / jnp.trace(k)
        e = jnp.abs(jnp.linalg.eigh(k)[0])
        return (1.0 / (1.0 - alpha)) * jnp.log2(jnp.sum(e ** alpha))

    kx, ky = gram(inputs), gram(sensitive)
    hx, hy, hxy = ent(kx), ent(ky), ent(kx * ky)
    ixy = hx + hy - hxy
    if normalize:
        ixy = ixy / jnp.maximum(hx, hy)
    return ixy


# ----------------------------------------------------------------------------
# Demo
# ----------------------------------------------------------------------------

if __name__ == "__main__":
    key = jax.random.PRNGKey(0)
    k1, k2, k3 = jax.random.split(key, 3)

    N, DX, DY = 64, 32, 8          # padded internally to 128 samples
    inputs = jax.random.normal(k1, (N, DX), dtype=jnp.float32)
    sensitive = jax.random.normal(k2, (N, DY), dtype=jnp.float32)
    target = jax.random.bernoulli(k3, 0.5, (N,)).astype(jnp.int32)

    SIGMA, ALPHA = 4.0, 1.01
    metric = MetricRenyiPallas(sigma=SIGMA, type_="marginal",
                               alpha=ALPHA, normalize=True)

    ixy = jax.block_until_ready(metric(inputs, target, sensitive))
    ref = jax.block_until_ready(
        _reference(inputs, target, sensitive, SIGMA, ALPHA, True))

    assert bool(jnp.isfinite(ixy)), "non-finite result"
    assert abs(float(ixy) - float(ref)) < 5e-3, (float(ixy), float(ref))

    print("KERNEL_OK")
</pallas_src>

<mosaic_0001>
module attributes {stable_mosaic.version = 11 : i64} {
  func.func @_fused_gram_kernel(%arg0: i32, %arg1: memref<1xi32, #tpu.memory_space<smem>>, %arg2: memref<1xi32, #tpu.memory_space<smem>>, %arg3: memref<128x32xf32, #tpu.memory_space<vmem>>, %arg4: memref<128x32xf32, #tpu.memory_space<vmem>>, %arg5: memref<128x8xf32, #tpu.memory_space<vmem>>, %arg6: memref<128x8xf32, #tpu.memory_space<vmem>>, %arg7: memref<128x1xf32, #tpu.memory_space<vmem>>, %arg8: memref<1x128xf32, #tpu.memory_space<vmem>>, %arg9: memref<128x1xf32, #tpu.memory_space<vmem>>, %arg10: memref<1x128xf32, #tpu.memory_space<vmem>>, %arg11: memref<128x128xf32, #tpu.memory_space<vmem>>, %arg12: memref<128x128xf32, #tpu.memory_space<vmem>>, %arg13: memref<128x128xf32, #tpu.memory_space<vmem>>) attributes {dimension_semantics = [#tpu.dimension_semantics<parallel>], iteration_bounds = array<i64: 1>, scalar_prefetch = 2 : i64, scratch_operands = 0 : i64, tpu.core_type = #tpu.core_type<tc>, window_params = [{transform_indices = @transform_0, window_bounds = array<i64: 128, 32>}, {transform_indices = @transform_1, window_bounds = array<i64: 128, 32>}, {transform_indices = @transform_2, window_bounds = array<i64: 128, 8>}, {transform_indices = @transform_3, window_bounds = array<i64: 128, 8>}, {transform_indices = @transform_4, window_bounds = array<i64: 128, 1>}, {transform_indices = @transform_5, window_bounds = array<i64: 1, 128>}, {transform_indices = @transform_6, window_bounds = array<i64: 128, 1>}, {transform_indices = @transform_7, window_bounds = array<i64: 1, 128>}, {transform_indices = @transform_8, window_bounds = array<i64: 128, 128>}, {transform_indices = @transform_9, window_bounds = array<i64: 128, 128>}, {transform_indices = @transform_10, window_bounds = array<i64: 128, 128>}]} {
    %0 = arith.index_cast %arg0 : i32 to index
    %1 = memref.load %arg1[%0] : memref<1xi32, #tpu.memory_space<smem>>
    %2 = arith.index_cast %arg0 : i32 to index
    %3 = memref.load %arg2[%2] : memref<1xi32, #tpu.memory_space<smem>>
    %c0 = arith.constant 0 : index
    %c0_0 = arith.constant 0 : index
    %4 = vector.load %arg3[%c0, %c0_0] : memref<128x32xf32, #tpu.memory_space<vmem>>, vector<128x32xf32>
    %c0_1 = arith.constant 0 : index
    %c0_2 = arith.constant 0 : index
    %5 = vector.load %arg4[%c0_1, %c0_2] : memref<128x32xf32, #tpu.memory_space<vmem>>, vector<128x32xf32>
    %cst = arith.constant dense<0.000000e+00> : vector<128x128xf32>
    %6 = tpu.matmul %4, %5, %cst {dimension_numbers = #tpu.dot_dimension_numbers<[1], [1], [0], [0], [0, 0, 1, 0], [], []>} : vector<128x32xf32>, vector<128x32xf32>, vector<128x128xf32> -> vector<128x128xf32>
    %c0_3 = arith.constant 0 : index
    %c0_4 = arith.constant 0 : index
    %7 = vector.load %arg7[%c0_3, %c0_4] : memref<128x1xf32, #tpu.memory_space<vmem>>, vector<128x1xf32>
    %c0_5 = arith.constant 0 : index
    %c0_6 = arith.constant 0 : index
    %8 = vector.load %arg8[%c0_5, %c0_6] : memref<1x128xf32, #tpu.memory_space<vmem>>, vector<1x128xf32>
    %9 = vector.broadcast %7 : vector<128x1xf32> to vector<128x128xf32>
    %10 = vector.broadcast %8 : vector<1x128xf32> to vector<128x128xf32>
    %11 = arith.addf %9, %10 : vector<128x128xf32>
    %cst_7 = arith.constant 2.000000e+00 : f32
    %12 = vector.broadcast %cst_7 : f32 to vector<128x128xf32>
    %13 = arith.mulf %12, %6 : vector<128x128xf32>
    %14 = arith.subf %11, %13 : vector<128x128xf32>
    %cst_8 = arith.constant 0.000000e+00 : f32
    %15 = vector.broadcast %cst_8 : f32 to vector<128x128xf32>
    %16 = arith.maximumf %14, %15 : vector<128x128xf32>
    %cst_9 = arith.constant -3.125000e-02 : f32
    %17 = vector.broadcast %cst_9 : f32 to vector<128x128xf32>
    %18 = arith.mulf %16, %17 : vector<128x128xf32>
    %19 = math.exp %18 : vector<128x128xf32>
    %c0_10 = arith.constant 0 : index
    %c0_11 = arith.constant 0 : index
    %20 = vector.load %arg11[%c0_10, %c0_11] : memref<128x128xf32, #tpu.memory_space<vmem>>, vector<128x128xf32>
    tpu.vector_store %arg11[%c0_10, %c0_11], %19 {strides = array<i32>} : memref<128x128xf32, #tpu.memory_space<vmem>>, vector<128x128xf32>,
    %c0_12 = arith.constant 0 : index
    %c0_13 = arith.constant 0 : index
    %21 = vector.load %arg5[%c0_12, %c0_13] : memref<128x8xf32, #tpu.memory_space<vmem>>, vector<128x8xf32>
    %c0_14 = arith.constant 0 : index
    %c0_15 = arith.constant 0 : index
    %22 = vector.load %arg6[%c0_14, %c0_15] : memref<128x8xf32, #tpu.memory_space<vmem>>, vector<128x8xf32>
    %cst_16 = arith.constant dense<0.000000e+00> : vector<128x128xf32>
    %23 = tpu.matmul %21, %22, %cst_16 {dimension_numbers = #tpu.dot_dimension_numbers<[1], [1], [0], [0], [0, 0, 1, 0], [], []>} : vector<128x8xf32>, vector<128x8xf32>, vector<128x128xf32> -> vector<128x128xf32>
    %c0_17 = arith.constant 0 : index
    %c0_18 = arith.constant 0 : index
    %24 = vector.load %arg9[%c0_17, %c0_18] : memref<128x1xf32, #tpu.memory_space<vmem>>, vector<128x1xf32>
    %c0_19 = arith.constant 0 : index
    %c0_20 = arith.constant 0 : index
    %25 = vector.load %arg10[%c0_19, %c0_20] : memref<1x128xf32, #tpu.memory_space<vmem>>, vector<1x128xf32>
    %26 = vector.broadcast %24 : vector<128x1xf32> to vector<128x128xf32>
    %27 = vector.broadcast %25 : vector<1x128xf32> to vector<128x128xf32>
    %28 = arith.addf %26, %27 : vector<128x128xf32>
    %cst_21 = arith.constant 2.000000e+00 : f32
    %29 = vector.broadcast %cst_21 : f32 to vector<128x128xf32>
    %30 = arith.mulf %29, %23 : vector<128x128xf32>
    %31 = arith.subf %28, %30 : vector<128x128xf32>
    %cst_22 = arith.constant 0.000000e+00 : f32
    %32 = vector.broadcast %cst_22 : f32 to vector<128x128xf32>
    %33 = arith.maximumf %31, %32 : vector<128x128xf32>
    %cst_23 = arith.constant -3.125000e-02 : f32
    %34 = vector.broadcast %cst_23 : f32 to vector<128x128xf32>
    %35 = arith.mulf %33, %34 : vector<128x128xf32>
    %36 = math.exp %35 : vector<128x128xf32>
    %c0_24 = arith.constant 0 : index
    %c0_25 = arith.constant 0 : index
    %37 = vector.load %arg12[%c0_24, %c0_25] : memref<128x128xf32, #tpu.memory_space<vmem>>, vector<128x128xf32>
    tpu.vector_store %arg12[%c0_24, %c0_25], %36 {strides = array<i32>} : memref<128x128xf32, #tpu.memory_space<vmem>>, vector<128x128xf32>,
    %38 = arith.cmpi eq, %1, %3 : i32
    %39 = arith.extui %38 : i1 to i32
    %c0_i32 = arith.constant 0 : i32
    %40 = arith.cmpi ne, %39, %c0_i32 : i32
    scf.if %40 {
      %45 = tpu.iota {dimensions = array<i32: 0>} : vector<128x1xi32>
      %46 = tpu.iota {dimensions = array<i32: 1>} : vector<1x128xi32>
      %47 = vector.broadcast %45 : vector<128x1xi32> to vector<128x128xi32>
      %48 = vector.broadcast %46 : vector<1x128xi32> to vector<128x128xi32>
      %49 = arith.cmpi eq, %47, %48 : vector<128x128xi32>
      %c0_32 = arith.constant 0 : index
      %c0_33 = arith.constant 0 : index
      %50 = vector.load %arg11[%c0_32, %c0_33] : memref<128x128xf32, #tpu.memory_space<vmem>>, vector<128x128xf32>
      %cst_34 = arith.constant 1.000000e+00 : f32
      %51 = vector.broadcast %cst_34 : f32 to vector<128x128xf32>
      %52 = arith.select %49, %51, %50 : vector<128x128xi1>, vector<128x128xf32>
      %c0_35 = arith.constant 0 : index
      %c0_36 = arith.constant 0 : index
      %53 = vector.load %arg11[%c0_35, %c0_36] : memref<128x128xf32, #tpu.memory_space<vmem>>, vector<128x128xf32>
      tpu.vector_store %arg11[%c0_35, %c0_36], %52 {strides = array<i32>} : memref<128x128xf32, #tpu.memory_space<vmem>>, vector<128x128xf32>,
      %c0_37 = arith.constant 0 : index
      %c0_38 = arith.constant 0 : index
      %54 = vector.load %arg12[%c0_37, %c0_38] : memref<128x128xf32, #tpu.memory_space<vmem>>, vector<128x128xf32>
      %cst_39 = arith.constant 1.000000e+00 : f32
      %55 = vector.broadcast %cst_39 : f32 to vector<128x128xf32>
      %56 = arith.select %49, %55, %54 : vector<128x128xi1>, vector<128x128xf32>
      %c0_40 = arith.constant 0 : index
      %c0_41 = arith.constant 0 : index
      %57 = vector.load %arg12[%c0_40, %c0_41] : memref<128x128xf32, #tpu.memory_space<vmem>>, vector<128x128xf32>
      tpu.vector_store %arg12[%c0_40, %c0_41], %56 {strides = array<i32>} : memref<128x128xf32, #tpu.memory_space<vmem>>, vector<128x128xf32>,
    } else {
    }
    %c0_26 = arith.constant 0 : index
    %c0_27 = arith.constant 0 : index
    %41 = vector.load %arg11[%c0_26, %c0_27] : memref<128x128xf32, #tpu.memory_space<vmem>>, vector<128x128xf32>
    %c0_28 = arith.constant 0 : index
    %c0_29 = arith.constant 0 : index
    %42 = vector.load %arg12[%c0_28, %c0_29] : memref<128x128xf32, #tpu.memory_space<vmem>>, vector<128x128xf32>
    %43 = arith.mulf %41, %42 : vector<128x128xf32>
    %c0_30 = arith.constant 0 : index
    %c0_31 = arith.constant 0 : index
    %44 = vector.load %arg13[%c0_30, %c0_31] : memref<128x128xf32, #tpu.memory_space<vmem>>, vector<128x128xf32>
    tpu.vector_store %arg13[%c0_30, %c0_31], %43 {strides = array<i32>} : memref<128x128xf32, #tpu.memory_space<vmem>>, vector<128x128xf32>,
    return
  }
  func.func @transform_0(%arg0: i32, %arg1: memref<1xi32, #tpu.memory_space<smem>>, %arg2: memref<1xi32, #tpu.memory_space<smem>>) -> (i32, i32) {
    %0 = arith.index_cast %arg0 : i32 to index
    %1 = memref.load %arg1[%0] : memref<1xi32, #tpu.memory_space<smem>>
    %c0_i32 = arith.constant 0 : i32
    %c0_i32_0 = arith.constant 0 : i32
    return %1, %c0_i32 : i32, i32
  }
  func.func @transform_1(%arg0: i32, %arg1: memref<1xi32, #tpu.memory_space<smem>>, %arg2: memref<1xi32, #tpu.memory_space<smem>>) -> (i32, i32) {
    %0 = arith.index_cast %arg0 : i32 to index
    %1 = memref.load %arg2[%0] : memref<1xi32, #tpu.memory_space<smem>>
    %c0_i32 = arith.constant 0 : i32
    %c0_i32_0 = arith.constant 0 : i32
    return %1, %c0_i32 : i32, i32
  }
  func.func @transform_2(%arg0: i32, %arg1: memref<1xi32, #tpu.memory_space<smem>>, %arg2: memref<1xi32, #tpu.memory_space<smem>>) -> (i32, i32) {
    %0 = arith.index_cast %arg0 : i32 to index
    %1 = memref.load %arg1[%0] : memref<1xi32, #tpu.memory_space<smem>>
    %c0_i32 = arith.constant 0 : i32
    %c0_i32_0 = arith.constant 0 : i32
    return %1, %c0_i32 : i32, i32
  }
  func.func @transform_3(%arg0: i32, %arg1: memref<1xi32, #tpu.memory_space<smem>>, %arg2: memref<1xi32, #tpu.memory_space<smem>>) -> (i32, i32) {
    %0 = arith.index_cast %arg0 : i32 to index
    %1 = memref.load %arg2[%0] : memref<1xi32, #tpu.memory_space<smem>>
    %c0_i32 = arith.constant 0 : i32
    %c0_i32_0 = arith.constant 0 : i32
    return %1, %c0_i32 : i32, i32
  }
  func.func @transform_4(%arg0: i32, %arg1: memref<1xi32, #tpu.memory_space<smem>>, %arg2: memref<1xi32, #tpu.memory_space<smem>>) -> (i32, i32) {
    %0 = arith.index_cast %arg0 : i32 to index
    %1 = memref.load %arg1[%0] : memref<1xi32, #tpu.memory_space<smem>>
    %c0_i32 = arith.constant 0 : i32
    %c0_i32_0 = arith.constant 0 : i32
    return %1, %c0_i32 : i32, i32
  }
  func.func @transform_5(%arg0: i32, %arg1: memref<1xi32, #tpu.memory_space<smem>>, %arg2: memref<1xi32, #tpu.memory_space<smem>>) -> (i32, i32) {
    %0 = arith.index_cast %arg0 : i32 to index
    %1 = memref.load %arg2[%0] : memref<1xi32, #tpu.memory_space<smem>>
    %c0_i32 = arith.constant 0 : i32
    %c0_i32_0 = arith.constant 0 : i32
    return %c0_i32, %1 : i32, i32
  }
  func.func @transform_6(%arg0: i32, %arg1: memref<1xi32, #tpu.memory_space<smem>>, %arg2: memref<1xi32, #tpu.memory_space<smem>>) -> (i32, i32) {
    %0 = arith.index_cast %arg0 : i32 to index
    %1 = memref.load %arg1[%0] : memref<1xi32, #tpu.memory_space<smem>>
    %c0_i32 = arith.constant 0 : i32
    %c0_i32_0 = arith.constant 0 : i32
    return %1, %c0_i32 : i32, i32
  }
  func.func @transform_7(%arg0: i32, %arg1: memref<1xi32, #tpu.memory_space<smem>>, %arg2: memref<1xi32, #tpu.memory_space<smem>>) -> (i32, i32) {
    %0 = arith.index_cast %arg0 : i32 to index
    %1 = memref.load %arg2[%0] : memref<1xi32, #tpu.memory_space<smem>>
    %c0_i32 = arith.constant 0 : i32
    %c0_i32_0 = arith.constant 0 : i32
    return %c0_i32, %1 : i32, i32
  }
  func.func @transform_8(%arg0: i32, %arg1: memref<1xi32, #tpu.memory_space<smem>>, %arg2: memref<1xi32, #tpu.memory_space<smem>>) -> (i32, i32) {
    %0 = arith.index_cast %arg0 : i32 to index
    %1 = memref.load %arg1[%0] : memref<1xi32, #tpu.memory_space<smem>>
    %2 = arith.index_cast %arg0 : i32 to index
    %3 = memref.load %arg2[%2] : memref<1xi32, #tpu.memory_space<smem>>
    %c0_i32 = arith.constant 0 : i32
    return %1, %3 : i32, i32
  }
  func.func @transform_9(%arg0: i32, %arg1: memref<1xi32, #tpu.memory_space<smem>>, %arg2: memref<1xi32, #tpu.memory_space<smem>>) -> (i32, i32) {
    %0 = arith.index_cast %arg0 : i32 to index
    %1 = memref.load %arg1[%0] : memref<1xi32, #tpu.memory_space<smem>>
    %2 = arith.index_cast %arg0 : i32 to index
    %3 = memref.load %arg2[%2] : memref<1xi32, #tpu.memory_space<smem>>
    %c0_i32 = arith.constant 0 : i32
    return %1, %3 : i32, i32
  }
  func.func @transform_10(%arg0: i32, %arg1: memref<1xi32, #tpu.memory_space<smem>>, %arg2: memref<1xi32, #tpu.memory_space<smem>>) -> (i32, i32) {
    %0 = arith.index_cast %arg0 : i32 to index
    %1 = memref.load %arg1[%0] : memref<1xi32, #tpu.memory_space<smem>>
    %2 = arith.index_cast %arg0 : i32 to index
    %3 = memref.load %arg2[%2] : memref<1xi32, #tpu.memory_space<smem>>
    %c0_i32 = arith.constant 0 : i32
    return %1, %3 : i32, i32
  }
}

</mosaic_0001>

<bundles_post_ra>
// kernel: tpu_custom_call.1
= control target key start
LH: loop header
LB: loop body
LE: loop exit
PB: predicated region body
PF: predicated region fallthrough
CT: control target
= control target key end

     0   :  { %s2732_s0 = inlined_call_operand.<no memory space> [shape: s32[1], index: 0, kind: input, shape index: {}]   ;;  %s2733_s1 = inlined_call_operand.<no memory space> [shape: s32[1], index: 1, kind: input, shape index: {}]   ;;  %s2734_s2 = inlined_call_operand.vmem [shape: f32[128,32], index: 2, kind: input, shape index: {}]   ;;  %s2735_s3 = inlined_call_operand.vmem [shape: f32[128,32], index: 3, kind: input, shape index: {}]   ;;  %s2736_s4 = inlined_call_operand.vmem [shape: f32[128,8], index: 4, kind: input, shape index: {}]   ;;  %s2737_s5 = inlined_call_operand.vmem [shape: f32[128,8], index: 5, kind: input, shape index: {}]   ;;  %s2738_s6 = inlined_call_operand.vmem [shape: f32[128,1], index: 6, kind: input, shape index: {}]   ;;  %s2739_s7 = inlined_call_operand.vmem [shape: f32[1,128], index: 7, kind: input, shape index: {}]   ;;  %s2740_s8 = inlined_call_operand.vmem [shape: f32[128,1], index: 8, kind: input, shape index: {}]   ;;  %s2741_s9 = inlined_call_operand.vmem [shape: f32[1,128], index: 9, kind: input, shape index: {}]   ;;  %s2742_s10 = inlined_call_operand.hbm [shape: f32[128,128], index: 10, kind: output, shape index: {0}]   ;;  %s2743_s11 = inlined_call_operand.hbm [shape: f32[128,128], index: 11, kind: output, shape index: {1}]   ;;  %s2744_s12 = inlined_call_operand.hbm [shape: f32[128,128], index: 12, kind: output, shape index: {2}]  }
   0x1   :  { %18 = sst [smem:[#allocation3]] %s2732_s0 }
   0x2   :  { %19 = sst [smem:[#allocation4]] %s2733_s1 }
   0x3   :  { %20 = vsyncpa [#allocation6], 0 }
   0x4   :  { %21 = vsyncpa [#allocation8], 0  ;;  %s2119_s25 = sld [smem:[#allocation4]]  ;;  %v2042_v0 = vmov 0   ;;  %vm241_vm0 = vcmask 261120   ;;  %vm746_vm1 = vcmask 64512  }
   0x5   :  { %s2121_s26 = sld [smem:[#allocation3]]  ;;  %1901 = vset.pattern.permute.xlu1 %v2042_v0  ;;  %1900 = vset.pattern.permute.xlu0 %v2042_v0  ;;  %vm2127_vm2 = vmpackc.low %vm241_vm0, %vm241_vm0 }
   0x6   :  { %vm2143_vm3 = vmpackc.low %vm746_vm1, %vm746_vm1 }
   0xa   :  { %s1539_s27 = sshll.u32 %s2119_s25, 4  ;;  %p181_p2 = scmp.lt.s32.totalorder %s2119_s25, 0 }
   0xb   :  { %s1545_s28 = sshll.u32 %s2121_s26, 4  ;;  %p150_p0 = scmp.lt.s32.totalorder %s1539_s27, 15 }
   0xc   :  { %p174_p1 = scmp.lt.s32.totalorder %s1545_s28, 15  ;;  %p1615_p3 = scmp.ne.s32.totalorder %s2121_s26, %s2119_s25 }
   0xd   :  { %s2750_s27 = smov (!%p150_p0, %s1539_s27), 15 }
   0xe   :  { %s1540_s0 = sshll.u32 %s2750_s27, 3  ;;  %s2752_s28 = smov (!%p174_p1, %s1545_s28), 15 }
   0xf   :  { %s2134_s30 = scalar_lea.vmem %s2735_s3, %s1540_s0  ;;  %s2139_s15 = scalar_lea.vmem %s2737_s5, %s1540_s0 }
  0x10   :  { %v225_v3 = vld [vmem:[%s2134_s30] sm:$0xff]  ;;  %v226_v4 = vld [vmem:[%s2134_s30 + $0x8] sm:$0xff]  ;;  %v227_v8 = vld [vmem:[%s2134_s30 + $0x10] sm:$0xff]  ;;  %s2161_s3 = sshll.u32 %s2752_s28, 3 }
  0x11   :  { %v730_v5 = vld [vmem:[%s2139_s15] sm:$0xff]  ;;  %v1798_v6 = vpack.c.bf16 %v226_v4, %v225_v3  ;;  %v731_v7 = vld [vmem:[%s2139_s15 + $0x8] sm:$0xff]  ;;  %v228_v9 = vld [vmem:[%s2134_s30 + $0x18] sm:$0xff]  ;;  %s2177_s17 = scalar_lea.vmem %s2738_s6, %s2161_s3  ;;  %s2183_s20 = scalar_lea.vmem %s2734_s2, %s2161_s3 }
  0x12   :  { %v1846_v10 = vpack.c.bf16 %v731_v7, %v730_v5  ;;  %v1804_v11 = vpack.c.bf16 %v228_v9, %v227_v8  ;;  %v732_v12 = vld [vmem:[%s2139_s15 + $0x10] sm:$0xff]  ;;  %v733_v13 = vld [vmem:[%s2139_s15 + $0x18] sm:$0xff]  ;;  %v229_v15 = vld [vmem:[%s2134_s30 + $0x20] sm:$0xff]  ;;  %s2189_s23 = scalar_lea.vmem %s2736_s4, %s2161_s3  ;;  %s2257_s6 = scalar_lea.vmem %s2740_s8, %s2161_s3 }
  0x13   :  { %1800 = vmatprep.subr.msk.bf16.mxu0 %vm2127_vm2, %v1798_v6  ;;  %v1852_v14 = vpack.c.bf16 %v733_v13, %v732_v12  ;;  %v230_v16 = vld [vmem:[%s2134_s30 + $0x28] sm:$0xff]  ;;  %v734_v17 = vld [vmem:[%s2139_s15 + $0x20] sm:$0xff]  ;;  %v485_v21 = vld [vmem:[%s2177_s17 + $0x10] sm:$0xff]  ;;  %s182_s8 = scalar_select %p181_p2, %s2119_s25, 0 }
  0x14   :  { %1848 = vmatprep.subr.msk.bf16.mxu1 %vm2143_vm3, %v1846_v10  ;;  %1803 = vmatpush3.bf16.xpose.msk.msra.mxu0 %vm2127_vm2, %v1798_v6  ;;  %v735_v18 = vld [vmem:[%s2139_s15 + $0x28] sm:$0xff]  ;;  %v1810_v19 = vpack.c.bf16 %v230_v16, %v229_v15  ;;  %v483_v22 = vld [vmem:[%s2177_s17] sm:$0xff]  ;;  %v486_v23 = vld [vmem:[%s2177_s17 + $0x18] sm:$0xff] }
  0x15   :  { %1851 = vmatpush3.bf16.xpose.msk.msra.mxu1 %vm2143_vm3, %v1846_v10  ;;  %1806 = vmatprep.subr.msk.bf16.mxu0 %vm2127_vm2, %v1804_v11  ;;  %v1858_v20 = vpack.c.bf16 %v735_v18, %v734_v17  ;;  %v209_v24 = vld [vmem:[%s2183_s20] sm:$0xff]  ;;  %v484_v26 = vld [vmem:[%s2177_s17 + $0x8] sm:$0xff]  ;;  %v231_v27 = vld [vmem:[%s2134_s30 + $0x30] sm:$0xff]  ;;  %s183_s28 = scalar_lea.vmem %s2739_s7, %s182_s8  ;;  %s196_s29 = scalar_lea.vmem %s2741_s9, %s182_s8 }
  0x16   :  { %1854 = vmatprep.subr.msk.bf16.mxu1 %vm2143_vm3, %v1852_v14  ;;  %512 = vperm.xlu1 %1901, %v485_v21   ;;  %v714_v25 = vld [vmem:[%s2189_s23] sm:$0xff]  ;;  %v232_v28 = vld [vmem:[%s2134_s30 + $0x38] sm:$0xff]  ;;  %v736_v29 = vld [vmem:[%s2139_s15 + $0x30] sm:$0xff] }
  0x17   :  { %502 = vperm.xlu0 %1900, %v483_v22   ;;  %1718 = vmatprep.mubr.msk.f32.mxu0 %vm241_vm0, %v209_v24  ;;  %v737_v30 = vld [vmem:[%s2139_s15 + $0x38] sm:$0xff]  ;;  %v488_v31 = vld [vmem:[%s2177_s17 + $0x28] sm:$0xff]  ;;  %v1816_v32 = vpack.c.bf16 %v232_v28, %v231_v27  ;;  %v487_v33 = vld [vmem:[%s2177_s17 + $0x20] sm:$0xff] }
  0x18   :  { %1774 = vmatprep.mubr.msk.f32.mxu1 %vm746_vm1, %v714_v25  ;;  %v1864_v34 = vpack.c.bf16 %v737_v30, %v736_v29  ;;  %v490_v35 = vld [vmem:[%s2177_s17 + $0x38] sm:$0xff]  ;;  %v489_v36 = vld [vmem:[%s2177_s17 + $0x30] sm:$0xff]  ;;  %v233_v37 = vld [vmem:[%s2134_s30 + $0x40] sm:$0xff] }
  0x19   :  { %v234_v38 = vld [vmem:[%s2134_s30 + $0x48] sm:$0xff]  ;;  %v738_v39 = vld [vmem:[%s2139_s15 + $0x40] sm:$0xff]  ;;  %v494_v45 = vld [vmem:[%s2177_s17 + $0x58] sm:$0xff] }
  0x1a   :  { %517 = vperm.xlu1 %1901, %v486_v23   ;;  %v739_v40 = vld [vmem:[%s2139_s15 + $0x48] sm:$0xff]  ;;  %v1822_v42 = vpack.c.bf16 %v234_v38, %v233_v37  ;;  %v491_v43 = vld [vmem:[%s2177_s17 + $0x40] sm:$0xff]  ;;  %v493_v46 = vld [vmem:[%s2177_s17 + $0x50] sm:$0xff] }
  0x1b   :  { %507 = vperm.xlu0 %1900, %v484_v26   ;;  %v492_v41 = vld [vmem:[%s2177_s17 + $0x48] sm:$0xff]  ;;  %v1870_v44 = vpack.c.bf16 %v739_v40, %v738_v39  ;;  %v235_v47 = vld [vmem:[%s2134_s30 + $0x50] sm:$0xff]  ;;  %v236_v48 = vld [vmem:[%s2134_s30 + $0x58] sm:$0xff] }
  0x1c   :  { %1809 = vmatpush3.bf16.xpose.msk.msra.mxu0 %vm2127_vm2, %v1804_v11  ;;  %v740_v49 = vld [vmem:[%s2139_s15 + $0x50] sm:$0xff]  ;;  %v741_v50 = vld [vmem:[%s2139_s15 + $0x58] sm:$0xff]  ;;  %v496_v51 = vld [vmem:[%s2177_s17 + $0x68] sm:$0xff]  ;;  %v1828_v52 = vpack.c.bf16 %v236_v48, %v235_v47 }
  0x1d   :  { %1857 = vmatpush3.bf16.xpose.msk.msra.mxu1 %vm2143_vm3, %v1852_v14  ;;  %1812 = vmatprep.subr.msk.bf16.mxu0 %vm2127_vm2, %v1810_v19  ;;  %v495_v53 = vld [vmem:[%s2177_s17 + $0x60] sm:$0xff]  ;;  %v1876_v54 = vpack.c.bf16 %v741_v50, %v740_v49  ;;  %v498_v55 = vld [vmem:[%s2177_s17 + $0x78] sm:$0xff]  ;;  %v497_v56 = vld [vmem:[%s2177_s17 + $0x70] sm:$0xff] }
  0x1e   :  { %1860 = vmatprep.subr.msk.bf16.mxu1 %vm2143_vm3, %v1858_v20  ;;  %527 = vperm.xlu1 %1901, %v488_v31   ;;  %v237_v57 = vld [vmem:[%s2134_s30 + $0x60] sm:$0xff]  ;;  %v238_v58 = vld [vmem:[%s2134_s30 + $0x68] sm:$0xff]  ;;  %v991_v3 = vld [vmem:[%s2257_s6 + $0x18] sm:$0xff] }
  0x1f   :  { %522 = vperm.xlu0 %1900, %v487_v33   ;;  %v742_v59 = vld [vmem:[%s2139_s15 + $0x60] sm:$0xff]  ;;  %v743_v60 = vld [vmem:[%s2139_s15 + $0x68] sm:$0xff]  ;;  %v1834_v62 = vpack.c.bf16 %v238_v58, %v237_v57  ;;  %v990_v4 = vld [vmem:[%s2257_s6 + $0x10] sm:$0xff] }
  0x20   :  { %v989_v61 = vld [vmem:[%s2257_s6 + $0x8] sm:$0xff]  ;;  %v988_v63 = vld [vmem:[%s2257_s6] sm:$0xff]  ;;  %v1882_v0 = vpack.c.bf16 %v743_v60, %v742_v59  ;;  %v239_v5 = vld [vmem:[%s2134_s30 + $0x70] sm:$0xff] }
  0x21   :  { %v240_v6 = vld [vmem:[%s2134_s30 + $0x78] sm:$0xff]  ;;  %v744_v7 = vld [vmem:[%s2139_s15 + $0x70] sm:$0xff]  ;;  %v993_v9 = vld [vmem:[%s2257_s6 + $0x28] sm:$0xff] }
  0x22   :  { %537 = vperm.xlu1 %1901, %v490_v35   ;;  %v745_v8 = vld [vmem:[%s2139_s15 + $0x78] sm:$0xff]  ;;  %v1840_v10 = vpack.c.bf16 %v240_v6, %v239_v5  ;;  %v992_v11 = vld [vmem:[%s2257_s6 + $0x20] sm:$0xff]  ;;  %v994_v14 = vld [vmem:[%s2257_s6 + $0x30] sm:$0xff] }
  0x23   :  { %532 = vperm.xlu0 %1900, %v489_v36   ;;  %v1888_v12 = vpack.c.bf16 %v745_v8, %v744_v7  ;;  %v995_v13 = vld [vmem:[%s2257_s6 + $0x38] sm:$0xff]  ;;  %v997_v15 = vld [vmem:[%s2257_s6 + $0x48] sm:$0xff]  ;;  %v996_v16 = vld [vmem:[%s2257_s6 + $0x40] sm:$0xff] }
  0x24   :  { %1815 = vmatpush3.bf16.xpose.msk.msra.mxu0 %vm2127_vm2, %v1810_v19  ;;  %v999_v17 = vld [vmem:[%s2257_s6 + $0x58] sm:$0xff]  ;;  %v998_v18 = vld [vmem:[%s2257_s6 + $0x50] sm:$0xff]  ;;  %v210_v19 = vld [vmem:[%s2183_s20 + $0x8] sm:$0xff] }
  0x25   :  { %1863 = vmatpush3.bf16.xpose.msk.msra.mxu1 %vm2143_vm3, %v1858_v20  ;;  %1818 = vmatprep.subr.msk.bf16.mxu0 %vm2127_vm2, %v1816_v32  ;;  %v1001_v20 = vld [vmem:[%s2257_s6 + $0x68] sm:$0xff]  ;;  %v211_v22 = vld [vmem:[%s2183_s20 + $0x10] sm:$0xff]  ;;  %v1000_v23 = vld [vmem:[%s2257_s6 + $0x60] sm:$0xff] }
  0x26   :  { %1866 = vmatprep.subr.msk.bf16.mxu1 %vm2143_vm3, %v1864_v34  ;;  %547 = vperm.xlu1 %1901, %v492_v41   ;;  %v715_v21 = vld [vmem:[%s2189_s23 + $0x8] sm:$0xff]  ;;  %v716_v1 = vld [vmem:[%s2189_s23 + $0x10] sm:$0xff]  ;;  %v212_v2 = vld [vmem:[%s2183_s20 + $0x18] sm:$0xff] }
  0x27   :  { %542 = vperm.xlu0 %1900, %v491_v43   ;;  %v1003_v24 = vld [vmem:[%s2257_s6 + $0x78] sm:$0xff]  ;;  %v213_v26 = vld [vmem:[%s2183_s20 + $0x20] sm:$0xff]  ;;  %v1002_v28 = vld [vmem:[%s2257_s6 + $0x70] sm:$0xff] }
  0x28   :  { %v717_v25 = vld [vmem:[%s2189_s23 + $0x18] sm:$0xff]  ;;  %v718_v27 = vld [vmem:[%s2189_s23 + $0x20] sm:$0xff]  ;;  %v214_v29 = vld [vmem:[%s2183_s20 + $0x28] sm:$0xff] }
  0x29   :  { %v719_v30 = vld [vmem:[%s2189_s23 + $0x28] sm:$0xff]  ;;  %v215_v31 = vld [vmem:[%s2183_s20 + $0x30] sm:$0xff]  ;;  %v216_v33 = vld [vmem:[%s2183_s20 + $0x38] sm:$0xff] }
  0x2a   :  { %557 = vperm.xlu1 %1901, %v494_v45   ;;  %v217_v35 = vld [vmem:[%s2183_s20 + $0x40] sm:$0xff]  ;;  %v218_v37 = vld [vmem:[%s2183_s20 + $0x48] sm:$0xff]  ;;  %v219_v39 = vld [vmem:[%s2183_s20 + $0x50] sm:$0xff] }
  0x2b   :  { %552 = vperm.xlu0 %1900, %v493_v46   ;;  %v722_v36 = vld [vmem:[%s2189_s23 + $0x40] sm:$0xff]  ;;  %v723_v38 = vld [vmem:[%s2189_s23 + $0x48] sm:$0xff]  ;;  %v724_v40 = vld [vmem:[%s2189_s23 + $0x50] sm:$0xff] }
  0x2c   :  { %1821 = vmatpush3.bf16.xpose.msk.msra.mxu0 %vm2127_vm2, %v1816_v32  ;;  %v720_v32 = vld [vmem:[%s2189_s23 + $0x30] sm:$0xff]  ;;  %v220_v41 = vld [vmem:[%s2183_s20 + $0x58] sm:$0xff]  ;;  %v221_v43 = vld [vmem:[%s2183_s20 + $0x60] sm:$0xff] }
  0x2d   :  { %1869 = vmatpush3.bf16.xpose.msk.msra.mxu1 %vm2143_vm3, %v1864_v34  ;;  %1824 = vmatprep.subr.msk.bf16.mxu0 %vm2127_vm2, %v1822_v42  ;;  %v721_v34 = vld [vmem:[%s2189_s23 + $0x38] sm:$0xff]  ;;  %v222_v45 = vld [vmem:[%s2183_s20 + $0x68] sm:$0xff]  ;;  %v223_v47 = vld [vmem:[%s2183_s20 + $0x70] sm:$0xff] }
  0x2e   :  { %1872 = vmatprep.subr.msk.bf16.mxu1 %vm2143_vm3, %v1870_v44  ;;  %567 = vperm.xlu1 %1901, %v496_v51   ;;  %v727_v46 = vld [vmem:[%s2189_s23 + $0x68] sm:$0xff]  ;;  %v728_v48 = vld [vmem:[%s2189_s23 + $0x70] sm:$0xff]  ;;  %v224_v49 = vld [vmem:[%s2183_s20 + $0x78] sm:$0xff] }
  0x2f   :  { %562 = vperm.xlu0 %1900, %v495_v53   ;;  %v729_v50 = vld [vmem:[%s2189_s23 + $0x78] sm:$0xff] }
  0x32   :  { %577 = vperm.xlu1 %1901, %v498_v55  }
  0x33   :  { %572 = vperm.xlu0 %1900, %v497_v56  }
  0x34   :  { %1827 = vmatpush3.bf16.xpose.msk.msra.mxu0 %vm2127_vm2, %v1822_v42  ;;  %v725_v42 = vld [vmem:[%s2189_s23 + $0x58] sm:$0xff] }
  0x35   :  { %1875 = vmatpush3.bf16.xpose.msk.msra.mxu1 %vm2143_vm3, %v1870_v44  ;;  %1830 = vmatprep.subr.msk.bf16.mxu0 %vm2127_vm2, %v1828_v52  ;;  %v726_v44 = vld [vmem:[%s2189_s23 + $0x60] sm:$0xff] }
  0x36   :  { %1878 = vmatprep.subr.msk.bf16.mxu1 %vm2143_vm3, %v1876_v54  ;;  %1012 = vperm.xlu1 %1901, %v989_v61  }
  0x37   :  { %1007 = vperm.xlu0 %1900, %v988_v63  }
  0x3a   :  { %1022 = vperm.xlu1 %1901, %v991_v3  }
  0x3b   :  { %1017 = vperm.xlu0 %1900, %v990_v4  }
  0x3c   :  { %1833 = vmatpush3.bf16.xpose.msk.msra.mxu0 %vm2127_vm2, %v1828_v52 }
  0x3d   :  { %1881 = vmatpush3.bf16.xpose.msk.msra.mxu1 %vm2143_vm3, %v1876_v54  ;;  %1836 = vmatprep.subr.msk.bf16.mxu0 %vm2127_vm2, %v1834_v62 }
  0x3e   :  { %1884 = vmatprep.subr.msk.bf16.mxu1 %vm2143_vm3, %v1882_v0  ;;  %1032 = vperm.xlu1 %1901, %v993_v9  }
  0x3f   :  { %1027 = vperm.xlu0 %1900, %v992_v11  }
  0x42   :  { %1042 = vperm.xlu1 %1901, %v995_v13  }
  0x43   :  { %1037 = vperm.xlu0 %1900, %v994_v14  }
  0x44   :  { %1839 = vmatpush3.bf16.xpose.msk.msra.mxu0 %vm2127_vm2, %v1834_v62 }
  0x45   :  { %1887 = vmatpush3.bf16.xpose.msk.msra.mxu1 %vm2143_vm3, %v1882_v0  ;;  %1842 = vmatprep.subr.msk.bf16.mxu0 %vm2127_vm2, %v1840_v10 }
  0x46   :  { %1890 = vmatprep.subr.msk.bf16.mxu1 %vm2143_vm3, %v1888_v12  ;;  %1052 = vperm.xlu1 %1901, %v997_v15  }
  0x47   :  { %1047 = vperm.xlu0 %1900, %v996_v16  }
  0x4a   :  { %1062 = vperm.xlu1 %1901, %v999_v17   ;;  %v1581_v17 = vld [vmem:[%s183_s28] ss:$0 sm:$0xff] }
  0x4b   :  { %1057 = vperm.xlu0 %1900, %v998_v18  }
  0x4c   :  { %1845 = vmatpush3.bf16.xpose.msk.msra.mxu0 %vm2127_vm2, %v1840_v10 }
  0x4d   :  { %1893 = vmatpush3.bf16.xpose.msk.msra.mxu1 %vm2143_vm3, %v1888_v12 }
  0x4e   :  { %1072 = vperm.xlu1 %1901, %v1001_v20  }
  0x4f   :  { %1067 = vperm.xlu0 %1900, %v1000_v23  }
  0x52   :  { %1082 = vperm.xlu1 %1901, %v1003_v24  }
  0x53   :  { %1719 = vmatmul.mubr.msk.f32.vlgmr.msra.gmra.mrb[0].mxu0 %vm241_vm0, %v210_v19  ;;  %1077 = vperm.xlu0 %1900, %v1002_v28  }
  0x54   :  { %1775 = vmatmul.mubr.msk.f32.vlgmr.msra.gmra.mrb[0].mxu1 %vm746_vm1, %v715_v21  ;;  %1721 = vmatprep.mubr.msk.f32.mxu0 %vm241_vm0, %v211_v22 }
  0x55   :  { %1777 = vmatprep.mubr.msk.f32.mxu1 %vm746_vm1, %v716_v1 }
  0x57   :  { %1722 = vmatmul.mubr.msk.f32.gmra.mrb[2].mxu0 %vm241_vm0, %v212_v2  ;;  %v1614_v2 = vld [vmem:[%s196_s29] ss:$0 sm:$0xff] }
  0x58   :  { %1778 = vmatmul.mubr.msk.f32.gmra.mrb[2].mxu1 %vm746_vm1, %v717_v25  ;;  %1724 = vmatprep.mubr.msk.f32.mxu0 %vm241_vm0, %v213_v26 }
  0x59   :  { %1780 = vmatprep.mubr.msk.f32.mxu1 %vm746_vm1, %v718_v27 }
  0x5b   :  { %1725 = vmatmul.mubr.msk.f32.gmra.mrb[4].mxu0 %vm241_vm0, %v214_v29 }
  0x5c   :  { %1781 = vmatmul.mubr.msk.f32.gmra.mrb[4].mxu1 %vm746_vm1, %v719_v30  ;;  %1727 = vmatprep.mubr.msk.f32.mxu0 %vm241_vm0, %v215_v31 }
  0x5d   :  { %1783 = vmatprep.mubr.msk.f32.mxu1 %vm746_vm1, %v720_v32 }
  0x5f   :  { %1728 = vmatmul.mubr.msk.f32.gmra.mrb[6].mxu0 %vm241_vm0, %v216_v33 }
  0x60   :  { %1784 = vmatmul.mubr.msk.f32.gmra.mrb[6].mxu1 %vm746_vm1, %v721_v34  ;;  %1730 = vmatprep.mubr.msk.f32.mxu0 %vm241_vm0, %v217_v35 }
  0x61   :  { %1786 = vmatprep.mubr.msk.f32.mxu1 %vm746_vm1, %v722_v36 }
  0x63   :  { %1731 = vmatmul.mubr.msk.f32.gmra.mrb[8].mxu0 %vm241_vm0, %v218_v37 }
  0x64   :  { %1787 = vmatmul.mubr.msk.f32.gmra.mrb[8].mxu1 %vm746_vm1, %v723_v38  ;;  %1733 = vmatprep.mubr.msk.f32.mxu0 %vm241_vm0, %v219_v39 }
  0x65   :  { %1789 = vmatprep.mubr.msk.f32.mxu1 %vm746_vm1, %v724_v40 }
  0x67   :  { %1734 = vmatmul.mubr.msk.f32.gmra.mrb[10].mxu0 %vm241_vm0, %v220_v41 }
  0x68   :  { %1790 = vmatmul.mubr.msk.f32.gmra.mrb[10].mxu1 %vm746_vm1, %v725_v42  ;;  %1736 = vmatprep.mubr.msk.f32.mxu0 %vm241_vm0, %v221_v43 }
  0x69   :  { %1792 = vmatprep.mubr.msk.f32.mxu1 %vm746_vm1, %v726_v44 }
  0x6b   :  { %1737 = vmatmul.mubr.msk.f32.gmra.mrb[12].mxu0 %vm241_vm0, %v222_v45 }
  0x6c   :  { %1793 = vmatmul.mubr.msk.f32.gmra.mrb[12].mxu1 %vm746_vm1, %v727_v46  ;;  %1739 = vmatprep.mubr.msk.f32.mxu0 %vm241_vm0, %v223_v47 }
  0x6d   :  { %1795 = vmatprep.mubr.msk.f32.mxu1 %vm746_vm1, %v728_v48 }
  0x6f   :  { %1740 = vmatmul.mubr.msk.f32.gmra.mrb[14].mxu0 %vm241_vm0, %v224_v49 }
  0x70   :  { %1796 = vmatmul.mubr.msk.f32.gmra.mrb[14].mxu1 %vm746_vm1, %v729_v50 }
  0x95   :  { %v513_v51 = vpop.permute.xlu1 %512 }
  0x96   :  { %v503_v52 = vpop.permute.xlu0 %502  ;;  %v2373_v19 = vadd.f32 %v1581_v17, %v513_v51 }
  0x97   :  { %v586_v20 = vadd.f32 %v1581_v17, %v503_v52 }
  0x99   :  { %v518_v53 = vpop.permute.xlu1 %517 }
  0x9a   :  { %v508_v54 = vpop.permute.xlu0 %507  ;;  %v2375_v21 = vadd.f32 %v1581_v17, %v518_v53 }
  0x9b   :  { %v587_v22 = vadd.f32 %v1581_v17, %v508_v54 }
  0x9d   :  { %v528_v55 = vpop.permute.xlu1 %527 }
  0x9e   :  { %v523_v56 = vpop.permute.xlu0 %522  ;;  %v2377_v1 = vadd.f32 %v1581_v17, %v528_v55 }
  0x9f   :  { %v2379_v23 = vadd.f32 %v1581_v17, %v523_v56 }
  0xa1   :  { %v538_v57 = vpop.permute.xlu1 %537 }
  0xa2   :  { %v533_v58 = vpop.permute.xlu0 %532  ;;  %v2381_v25 = vadd.f32 %v1581_v17, %v538_v57 }
  0xa3   :  { %v2383_v26 = vadd.f32 %v1581_v17, %v533_v58 }
  0xa5   :  { %v548_v59 = vpop.permute.xlu1 %547 }
  0xa6   :  { %v543_v60 = vpop.permute.xlu0 %542  ;;  %v2385_v27 = vadd.f32 %v1581_v17, %v548_v59 }
  0xa7   :  { %v2387_v28 = vadd.f32 %v1581_v17, %v543_v60 }
  0xa9   :  { %v558_v61 = vpop.permute.xlu1 %557 }
  0xaa   :  { %v553_v62 = vpop.permute.xlu0 %552  ;;  %v2389_v29 = vadd.f32 %v1581_v17, %v558_v61 }
  0xab   :  { %v2391_v30 = vadd.f32 %v1581_v17, %v553_v62 }
  0xad   :  { %v568_v63 = vpop.permute.xlu1 %567 }
  0xae   :  { %v563_v0 = vpop.permute.xlu0 %562  ;;  %v2393_v31 = vadd.f32 %v1581_v17, %v568_v63 }
  0xaf   :  { %v2395_v32 = vadd.f32 %v1581_v17, %v563_v0 }
  0xb1   :  { %v578_v3 = vpop.permute.xlu1 %577 }
  0xb2   :  { %v573_v4 = vpop.permute.xlu0 %572  ;;  %v2397_v33 = vadd.f32 %v1581_v17, %v578_v3 }
  0xb3   :  { %v2399_v34 = vadd.f32 %v1581_v17, %v573_v4 }
  0xb5   :  { %v1013_v5 = vpop.permute.xlu1 %1012 }
  0xb6   :  { %v1008_v6 = vpop.permute.xlu0 %1007  ;;  %v1092_v35 = vadd.f32 %v1614_v2, %v1013_v5 }
  0xb7   :  { %v1091_v36 = vadd.f32 %v1614_v2, %v1008_v6 }
  0xb9   :  { %v1023_v7 = vpop.permute.xlu1 %1022 }
  0xba   :  { %v1018_v8 = vpop.permute.xlu0 %1017  ;;  %v1094_v37 = vadd.f32 %v1614_v2, %v1023_v7 }
  0xbb   :  { %v1093_v38 = vadd.f32 %v1614_v2, %v1018_v8 }
  0xbd   :  { %v1033_v9 = vpop.permute.xlu1 %1032 }
  0xbe   :  { %v1028_v10 = vpop.permute.xlu0 %1027  ;;  %v2401_v39 = vadd.f32 %v1614_v2, %v1033_v9 }
  0xbf   :  { %v2403_v40 = vadd.f32 %v1614_v2, %v1028_v10 }
  0xc1   :  { %v1043_v11 = vpop.permute.xlu1 %1042 }
  0xc2   :  { %v1038_v12 = vpop.permute.xlu0 %1037  ;;  %v2405_v43 = vadd.f32 %v1614_v2, %v1043_v11 }
  0xc3   :  { %v2407_v44 = vadd.f32 %v1614_v2, %v1038_v12 }
  0xc5   :  { %v1053_v13 = vpop.permute.xlu1 %1052 }
  0xc6   :  { %v1048_v14 = vpop.permute.xlu0 %1047  ;;  %v2409_v45 = vadd.f32 %v1614_v2, %v1053_v13 }
  0xc7   :  { %v2411_v49 = vadd.f32 %v1614_v2, %v1048_v14 }
  0xc9   :  { %v1063_v15 = vpop.permute.xlu1 %1062 }
  0xca   :  { %v1058_v16 = vpop.permute.xlu0 %1057  ;;  %v2413_v50 = vadd.f32 %v1614_v2, %v1063_v15 }
  0xcb   :  { %v2415_v55 = vadd.f32 %v1614_v2, %v1058_v16 }
  0xcd   :  { %v1073_v18 = vpop.permute.xlu1 %1072 }
  0xce   :  { %v1068_v24 = vpop.permute.xlu0 %1067  ;;  %v2417_v56 = vadd.f32 %v1614_v2, %v1073_v18 }
  0xcf   :  { %v2419_v59 = vadd.f32 %v1614_v2, %v1068_v24 }
  0xd1   :  { %v1083_v41 = vpop.permute.xlu1 %1082 }
  0xd2   :  { %v1078_v51 = vpop.permute.xlu0 %1077  ;;  %v2421_v60 = vadd.f32 %v1614_v2, %v1083_v41 }
  0xd3   :  { %v2423_v0 = vadd.f32 %v1614_v2, %v1078_v51 }
 0x126   :  { %v1720_v42 = vpop.f32.mrb[0].mxu0 }
 0x127   :  { %v603_v46 = vmul.f32 2.0, %v1720_v42  ;;  %v1776_v47 = vpop.f32.mrb[0].mxu1  ;;  %v404_v48 = vpop.f32.mrb[1].mxu0 }
 0x128   :  { %v1108_v52 = vmul.f32 2.0, %v1776_v47  ;;  %v602_v53 = vmul.f32 2.0, %v404_v48  ;;  %v909_v54 = vpop.f32.mrb[1].mxu1 }
 0x129   :  { %v619_v57 = vsub.f32 %v587_v22, %v603_v46  ;;  %v1107_v58 = vmul.f32 2.0, %v909_v54 }
 0x12a   :  { %v1124_v61 = vsub.f32 %v1092_v35, %v1108_v52  ;;  %v618_v62 = vsub.f32 %v586_v20, %v602_v53  ;;  %v1723_v63 = vpop.f32.mrb[2].mxu0 }
 0x12b   :  { %v635_v3 = vmax.f32 %v619_v57, 0.0  ;;  %v1123_v4 = vsub.f32 %v1091_v36, %v1107_v58  ;;  %v605_v5 = vmul.f32 2.0, %v1723_v63  ;;  %v1779_v6 = vpop.f32.mrb[2].mxu1  ;;  %v414_v7 = vpop.f32.mrb[3].mxu0 }
 0x12c   :  { %v1140_v8 = vmax.f32 %v1124_v61, 0.0  ;;  %v634_v9 = vmax.f32 %v618_v62, 0.0  ;;  %v1110_v10 = vmul.f32 2.0, %v1779_v6  ;;  %v604_v11 = vmul.f32 2.0, %v414_v7  ;;  %v919_v12 = vpop.f32.mrb[3].mxu1 }
 0x12d   :  { %v651_v13 = vmul.f32 -0.03125, %v635_v3  ;;  %v1139_v14 = vmax.f32 %v1123_v4, 0.0  ;;  %v621_v15 = vsub.f32 %v2375_v21, %v605_v5  ;;  %v1109_v16 = vmul.f32 2.0, %v919_v12 }
 0x12e   :  { %v1156_v17 = vmul.f32 -0.03125, %v1140_v8  ;;  %v650_v18 = vmul.f32 -0.03125, %v634_v9  ;;  %v1126_v20 = vsub.f32 %v1094_v37, %v1110_v10  ;;  %v620_v22 = vsub.f32 %v2373_v19, %v604_v11  ;;  %v1726_v2 = vpop.f32.mrb[4].mxu0 }
 0x12f   :  { %v668_v24 = vmul.f32 1.442695, %v651_v13  ;;  %v1155_v35 = vmul.f32 -0.03125, %v1139_v14  ;;  %v637_v36 = vmax.f32 %v621_v15, 0.0  ;;  %v1125_v41 = vsub.f32 %v1093_v38, %v1109_v16  ;;  %v1782_v42 = vpop.f32.mrb[4].mxu1  ;;  %v424_v46 = vpop.f32.mrb[5].mxu0 }
 0x130   :  { %v1173_v47 = vmul.f32 1.442695, %v1156_v17  ;;  %v666_v48 = vmul.f32 1.442695, %v650_v18  ;;  %v1142_v51 = vmax.f32 %v1126_v20, 0.0  ;;  %v636_v52 = vmax.f32 %v620_v22, 0.0 }
 0x131   :  { %1902 = vpow2.f32 %v668_v24  ;;  %v1171_v53 = vmul.f32 1.442695, %v1155_v35  ;;  %v653_v21 = vmul.f32 -0.03125, %v637_v36  ;;  %v1141_v54 = vmax.f32 %v1125_v41, 0.0  ;;  %v929_v57 = vpop.f32.mrb[5].mxu1 }
 0x132   :  { %1904 = vpow2.f32 %v1173_v47  ;;  %v1158_v37 = vmul.f32 -0.03125, %v1142_v51  ;;  %v652_v58 = vmul.f32 -0.03125, %v636_v52  ;;  %v607_v19 = vmul.f32 2.0, %v1726_v2  ;;  %v1729_v61 = vpop.f32.mrb[6].mxu0 }
 0x133   :  { %1906 = vpow2.f32 %v666_v48  ;;  %v672_v62 = vmul.f32 1.442695, %v653_v21  ;;  %v1157_v63 = vmul.f32 -0.03125, %v1141_v54  ;;  %v1112_v38 = vmul.f32 2.0, %v1782_v42  ;;  %v1785_v3 = vpop.f32.mrb[6].mxu1  ;;  %v434_v4 = vpop.f32.mrb[7].mxu0 }
 0x134   :  { %1908 = vpow2.f32 %v1171_v53  ;;  %v1177_v5 = vmul.f32 1.442695, %v1158_v37  ;;  %v670_v6 = vmul.f32 1.442695, %v652_v58  ;;  %v623_v7 = vsub.f32 %v2377_v1, %v607_v19  ;;  %v939_v8 = vpop.f32.mrb[7].mxu1 }
 0x135   :  { %1910 = vpow2.f32 %v672_v62  ;;  %v1175_v9 = vmul.f32 1.442695, %v1157_v63  ;;  %v1128_v10 = vsub.f32 %v2401_v39, %v1112_v38  ;;  %v606_v11 = vmul.f32 2.0, %v424_v46 }
 0x136   :  { %1912 = vpow2.f32 %v1177_v5  ;;  %v639_v12 = vmax.f32 %v623_v7, 0.0  ;;  %v1111_v13 = vmul.f32 2.0, %v929_v57  ;;  %v609_v14 = vmul.f32 2.0, %v1729_v61  ;;  %v1732_v15 = vpop.f32.mrb[8].mxu0 }
 0x137   :  { %1914 = vpow2.f32 %v670_v6  ;;  %v1144_v16 = vmax.f32 %v1128_v10, 0.0  ;;  %v622_v17 = vsub.f32 %v2379_v23, %v606_v11  ;;  %v1114_v18 = vmul.f32 2.0, %v1785_v3  ;;  %v1788_v20 = vpop.f32.mrb[8].mxu1  ;;  %v444_v22 = vpop.f32.mrb[9].mxu0 }
 0x138   :  { %1916 = vpow2.f32 %v1175_v9  ;;  %v655_v1 = vmul.f32 -0.03125, %v639_v12  ;;  %v1127_v2 = vsub.f32 %v2403_v40, %v1111_v13  ;;  %v625_v24 = vsub.f32 %v2381_v25, %v609_v14  ;;  %v949_v39 = vpop.f32.mrb[9].mxu1 }
 0x139   :  { %v1160_v35 = vmul.f32 -0.03125, %v1144_v16  ;;  %v638_v36 = vmax.f32 %v622_v17, 0.0  ;;  %v1130_v41 = vsub.f32 %v2405_v43, %v1114_v18  ;;  %v608_v42 = vmul.f32 2.0, %v434_v4 }
 0x13a   :  { %v676_v46 = vmul.f32 1.442695, %v655_v1  ;;  %v1143_v47 = vmax.f32 %v1127_v2, 0.0  ;;  %v641_v48 = vmax.f32 %v625_v24, 0.0  ;;  %v1113_v51 = vmul.f32 2.0, %v939_v8  ;;  %v1735_v23 = vpop.f32.mrb[10].mxu0 }
 0x13b   :  { %v1903_v52 = vpop.eup %1902  ;;  %v1181_v53 = vmul.f32 1.442695, %v1160_v35  ;;  %v654_v21 = vmul.f32 -0.03125, %v638_v36  ;;  %v1146_v54 = vmax.f32 %v1130_v41, 0.0  ;;  %v624_v57 = vsub.f32 %v2383_v26, %v608_v42  ;;  %v1791_v40 = vpop.f32.mrb[10].mxu1 }
 0x13c   :  { %v2434_v37 = vpop.f32.mrb[11].mxu0  ;;  %v1905_v25 = vpop.eup %1904  ;;  %699 = vst [vmem:[#allocation5 + $0x8] sm:$0xff] %v1903_v52  ;;  %1918 = vpow2.f32 %v676_v46  ;;  %v1159_v58 = vmul.f32 -0.03125, %v1143_v47  ;;  %v657_v43 = vmul.f32 -0.03125, %v641_v48  ;;  %v1129_v19 = vsub.f32 %v2407_v44, %v1113_v51 }
 0x13d   :  { %v959_v61 = vpop.f32.mrb[11].mxu1  ;;  %v1907_v62 = vpop.eup %1906  ;;  %1204 = vst [vmem:[#allocation7 + $0x8] sm:$0xff] %v1905_v25  ;;  %1920 = vpow2.f32 %v1181_v53  ;;  %v674_v63 = vmul.f32 1.442695, %v654_v21  ;;  %v1162_v38 = vmul.f32 -0.03125, %v1146_v54  ;;  %v640_v3 = vmax.f32 %v624_v57, 0.0 }
 0x13e   :  { %v1909_v4 = vpop.eup %1908  ;;  %698 = vst [vmem:[#allocation5] sm:$0xff] %v1907_v62  ;;  %v1179_v26 = vmul.f32 1.442695, %v1159_v58  ;;  %v680_v5 = vmul.f32 1.442695, %v657_v43  ;;  %v1145_v6 = vmax.f32 %v1129_v19, 0.0 }
 0x13f   :  { %v611_v7 = vmul.f32 2.0, %v1732_v15  ;;  %v1911_v8 = vpop.eup %1910  ;;  %1203 = vst [vmem:[#allocation7] sm:$0xff] %v1909_v4  ;;  %1922 = vpow2.f32 %v674_v63  ;;  %v1185_v9 = vmul.f32 1.442695, %v1162_v38  ;;  %v656_v10 = vmul.f32 -0.03125, %v640_v3  ;;  %v2437_v44 = vpop.f32.mrb[12].mxu0 }
 0x140   :  { %v1116_v11 = vmul.f32 2.0, %v1788_v20  ;;  %v2439_v12 = vpop.f32.mrb[12].mxu1  ;;  %v1913_v13 = vpop.eup %1912  ;;  %701 = vst [vmem:[#allocation5 + $0x18] sm:$0xff] %v1911_v8  ;;  %1924 = vpow2.f32 %v1179_v26  ;;  %v1161_v14 = vmul.f32 -0.03125, %v1145_v6  ;;  %v610_v17 = vmul.f32 2.0, %v444_v22 }
 0x141   :  { %v627_v16 = vsub.f32 %v2385_v27, %v611_v7  ;;  %v2442_v18 = vpop.f32.mrb[13].mxu0  ;;  %v2444_v15 = vpop.f32.mrb[13].mxu1  ;;  %1206 = vst [vmem:[#allocation7 + $0x18] sm:$0xff] %v1913_v13  ;;  %1926 = vpow2.f32 %v680_v5  ;;  %v678_v2 = vmul.f32 1.442695, %v656_v10  ;;  %v1115_v24 = vmul.f32 2.0, %v949_v39 }
 0x142   :  { %v1915_v1 = vpop.eup %1914  ;;  %v1132_v20 = vsub.f32 %v2409_v45, %v1116_v11  ;;  %1928 = vpow2.f32 %v1185_v9  ;;  %v1183_v36 = vmul.f32 1.442695, %v1161_v14  ;;  %v626_v42 = vsub.f32 %v2387_v28, %v610_v17  ;;  %v2448_v27 = vpop.f32.mrb[14].mxu0 }
 0x143   :  { %v1917_v35 = vpop.eup %1916  ;;  %700 = vst [vmem:[#allocation5 + $0x10] sm:$0xff] %v1915_v1  ;;  %v643_v41 = vmax.f32 %v627_v16, 0.0  ;;  %1930 = vpow2.f32 %v678_v2  ;;  %v1131_v46 = vsub.f32 %v2411_v49, %v1115_v24  ;;  %v613_v47 = vmul.f32 2.0, %v1735_v23  ;;  %v2451_v48 = vpop.f32.mrb[14].mxu1 }
 0x144   :  { %1205 = vst [vmem:[#allocation7 + $0x10] sm:$0xff] %v1917_v35  ;;  %v1148_v22 = vmax.f32 %v1132_v20, 0.0  ;;  %v2453_v51 = vpop.f32.mrb[15].mxu0  ;;  %1932 = vpow2.f32 %v1183_v36  ;;  %v642_v39 = vmax.f32 %v626_v42, 0.0  ;;  %v1118_v52 = vmul.f32 2.0, %v1791_v40  ;;  %v2455_v53 = vpop.f32.mrb[15].mxu1 }
 0x145   :  { %v659_v45 = vmul.f32 -0.03125, %v643_v41  ;;  %v1147_v28 = vmax.f32 %v1131_v46, 0.0  ;;  %v629_v54 = vsub.f32 %v2389_v29, %v613_v47  ;;  %v612_v57 = vmul.f32 2.0, %v2434_v37 }
 0x146   :  { %v1164_v21 = vmul.f32 -0.03125, %v1148_v22  ;;  %v1919_v25 = vpop.eup %1918  ;;  %v658_v49 = vmul.f32 -0.03125, %v642_v39  ;;  %v1134_v23 = vsub.f32 %v2413_v50, %v1118_v52  ;;  %v1117_v43 = vmul.f32 2.0, %v959_v61 }
 0x147   :  { %v684_v58 = vmul.f32 1.442695, %v659_v45  ;;  %v1921_v19 = vpop.eup %1920  ;;  %703 = vst [vmem:[#allocation5 + $0x28] sm:$0xff] %v1919_v25  ;;  %v1163_v63 = vmul.f32 -0.03125, %v1147_v28  ;;  %v645_v38 = vmax.f32 %v629_v54, 0.0  ;;  %v628_v40 = vsub.f32 %v2391_v30, %v612_v57 }
 0x148   :  { %v1189_v62 = vmul.f32 1.442695, %v1164_v21  ;;  %1208 = vst [vmem:[#allocation7 + $0x28] sm:$0xff] %v1921_v19  ;;  %v682_v3 = vmul.f32 1.442695, %v658_v49  ;;  %v1150_v4 = vmax.f32 %v1134_v23, 0.0  ;;  %v1133_v29 = vsub.f32 %v2415_v55, %v1117_v43 }
 0x149   :  { %1934 = vpow2.f32 %v684_v58  ;;  %v1923_v37 = vpop.eup %1922  ;;  %v1187_v26 = vmul.f32 1.442695, %v1163_v63  ;;  %v661_v5 = vmul.f32 -0.03125, %v645_v38  ;;  %v644_v6 = vmax.f32 %v628_v40, 0.0 }
 0x14a   :  { %1936 = vpow2.f32 %v1189_v62  ;;  %v1925_v50 = vpop.eup %1924  ;;  %702 = vst [vmem:[#allocation5 + $0x20] sm:$0xff] %v1923_v37  ;;  %v1166_v61 = vmul.f32 -0.03125, %v1150_v4  ;;  %v1149_v7 = vmax.f32 %v1133_v29, 0.0  ;;  %v615_v8 = vmul.f32 2.0, %v2437_v44 }
 0x14b   :  { %1938 = vpow2.f32 %v682_v3  ;;  %v1927_v9 = vpop.eup %1926  ;;  %1207 = vst [vmem:[#allocation7 + $0x20] sm:$0xff] %v1925_v50  ;;  %v688_v30 = vmul.f32 1.442695, %v661_v5  ;;  %v660_v10 = vmul.f32 -0.03125, %v644_v6  ;;  %v1120_v11 = vmul.f32 2.0, %v2439_v12 }
 0x14c   :  { %1940 = vpow2.f32 %v1187_v26  ;;  %v1929_v55 = vpop.eup %1928  ;;  %705 = vst [vmem:[#allocation5 + $0x38] sm:$0xff] %v1927_v9  ;;  %v1193_v13 = vmul.f32 1.442695, %v1166_v61  ;;  %v1165_v14 = vmul.f32 -0.03125, %v1149_v7  ;;  %v631_v16 = vsub.f32 %v2393_v31, %v615_v8 }
 0x14d   :  { %v614_v17 = vmul.f32 2.0, %v2442_v18  ;;  %v1931_v1 = vpop.eup %1930  ;;  %1210 = vst [vmem:[#allocation7 + $0x38] sm:$0xff] %v1929_v55  ;;  %1942 = vpow2.f32 %v688_v30  ;;  %v686_v2 = vmul.f32 1.442695, %v660_v10  ;;  %v1136_v44 = vsub.f32 %v2417_v56, %v1120_v11  ;;  %v1258_v55 = vld [vmem:[#allocation5] sm:$0xff] (!%p1615_p3) }
 0x14e   :  { %v1119_v20 = vmul.f32 2.0, %v2444_v15  ;;  %v1933_v24 = vpop.eup %1932  ;;  %704 = vst [vmem:[#allocation5 + $0x30] sm:$0xff] %v1931_v1  ;;  %1944 = vpow2.f32 %v1193_v13  ;;  %v1191_v12 = vmul.f32 1.442695, %v1165_v14  ;;  %v647_v35 = vmax.f32 %v631_v16, 0.0  ;;  %v1259_v14 = vld [vmem:[#allocation5 + $0x8] sm:$0xff] (!%p1615_p3) }
 0x14f   :  { %v630_v36 = vsub.f32 %v2395_v32, %v614_v17  ;;  %1209 = vst [vmem:[#allocation7 + $0x30] sm:$0xff] %v1933_v24  ;;  %1946 = vpow2.f32 %v686_v2  ;;  %v1152_v31 = vmax.f32 %v1136_v44, 0.0  ;;  %v617_v41 = vmul.f32 2.0, %v2448_v27  ;;  %v1260_v17 = vld [vmem:[#allocation5 + $0x10] sm:$0xff] (!%p1615_p3)  ;;  %v1261_v2 = vld [vmem:[#allocation5 + $0x18] sm:$0xff] (!%p1615_p3) }
 0x150   :  { %v1135_v18 = vsub.f32 %v2419_v59, %v1119_v20  ;;  %1948 = vpow2.f32 %v1191_v12  ;;  %v663_v42 = vmul.f32 -0.03125, %v647_v35  ;;  %v1122_v56 = vmul.f32 2.0, %v2451_v48 }
 0x151   :  { %v646_v22 = vmax.f32 %v630_v36, 0.0  ;;  %v1168_v15 = vmul.f32 -0.03125, %v1152_v31  ;;  %v633_v47 = vsub.f32 %v2397_v33, %v617_v41  ;;  %v616_v45 = vmul.f32 2.0, %v2453_v51  ;;  %v1262_v24 = vld [vmem:[#allocation5 + $0x20] sm:$0xff] (!%p1615_p3)  ;;  %v1263_v36 = vld [vmem:[#allocation5 + $0x28] sm:$0xff] (!%p1615_p3) }
 0x152   :  { %v1151_v46 = vmax.f32 %v1135_v18, 0.0  ;;  %v692_v32 = vmul.f32 1.442695, %v663_v42  ;;  %v1138_v21 = vsub.f32 %v2421_v60, %v1122_v56  ;;  %v1121_v59 = vmul.f32 2.0, %v2455_v53 }
 0x153   :  { %v1935_v39 = vpop.eup %1934  ;;  %v662_v52 = vmul.f32 -0.03125, %v646_v22  ;;  %v1197_v27 = vmul.f32 1.442695, %v1168_v15  ;;  %v649_v57 = vmax.f32 %v633_v47, 0.0  ;;  %v632_v48 = vsub.f32 %v2399_v34, %v616_v45  ;;  %v1265_v41 = vld [vmem:[#allocation5 + $0x38] sm:$0xff] (!%p1615_p3) }
 0x154   :  { %v1937_v28 = vpop.eup %1936  ;;  %707 = vst [vmem:[#allocation5 + $0x48] sm:$0xff] %v1935_v39  ;;  %v1167_v54 = vmul.f32 -0.03125, %v1151_v46  ;;  %1950 = vpow2.f32 %v692_v32  ;;  %v1154_v58 = vmax.f32 %v1138_v21, 0.0  ;;  %v1137_v51 = vsub.f32 %v2423_v0, %v1121_v59 }
 0x155   :  { %v1939_v25 = vpop.eup %1938  ;;  %1212 = vst [vmem:[#allocation7 + $0x48] sm:$0xff] %v1937_v28  ;;  %v690_v33 = vmul.f32 1.442695, %v662_v52  ;;  %1952 = vpow2.f32 %v1197_v27  ;;  %v665_v23 = vmul.f32 -0.03125, %v649_v57  ;;  %v648_v53 = vmax.f32 %v632_v48, 0.0  ;;  %v1264_v31 = vld [vmem:[#allocation5 + $0x30] sm:$0xff] (!%p1615_p3) }
 0x156   :  { %v1941_v49 = vpop.eup %1940  ;;  %706 = vst [vmem:[#allocation5 + $0x40] sm:$0xff] %v1939_v25  ;;  %v1195_v60 = vmul.f32 1.442695, %v1167_v54  ;;  %v1170_v43 = vmul.f32 -0.03125, %v1154_v58  ;;  %v1153_v19 = vmax.f32 %v1137_v51, 0.0  ;;  %v1223_v30 = vlaneseq (!%p1615_p3) }
 0x157   :  { %1211 = vst [vmem:[#allocation7 + $0x40] sm:$0xff] %v1941_v49  ;;  %1954 = vpow2.f32 %v690_v33  ;;  %v1943_v62 = vpop.eup %1942  ;;  %v696_v34 = vmul.f32 1.442695, %v665_v23  ;;  %v664_v63 = vmul.f32 -0.03125, %v648_v53  ;;  %v1306_v23 = vld [vmem:[#allocation7] sm:$0xff] (!%p1615_p3)  ;;  %v1307_v53 = vld [vmem:[#allocation7 + $0x8] sm:$0xff] (!%p1615_p3) }
 0x158   :  { %1956 = vpow2.f32 %v1195_v60  ;;  %v1945_v38 = vpop.eup %1944  ;;  %709 = vst [vmem:[#allocation5 + $0x58] sm:$0xff] %v1943_v62  ;;  %v1201_v40 = vmul.f32 1.442695, %v1170_v43  ;;  %v1169_v3 = vmul.f32 -0.03125, %v1153_v19  ;;  %v2480_v10 = vshrl.u32 (!%p1615_p3), %v1223_v30, 7  ;;  %v1308_v43 = vld [vmem:[#allocation7 + $0x10] sm:$0xff] (!%p1615_p3) }
 0x159   :  { %v1947_v4 = vpop.eup %1946  ;;  %1214 = vst [vmem:[#allocation7 + $0x58] sm:$0xff] %v1945_v38  ;;  %1958 = vpow2.f32 %v696_v34  ;;  %v694_v0 = vmul.f32 1.442695, %v664_v63  ;;  %v2482_v11 = vand.u32 (!%p1615_p3), 127, %v1223_v30  ;;  %v1309_v62 = vld [vmem:[#allocation7 + $0x18] sm:$0xff] (!%p1615_p3)  ;;  %v1310_v34 = vld [vmem:[#allocation7 + $0x20] sm:$0xff] (!%p1615_p3) }
 0x15a   :  { %v1949_v29 = vpop.eup %1948  ;;  %708 = vst [vmem:[#allocation5 + $0x50] sm:$0xff] %v1947_v4  ;;  %1960 = vpow2.f32 %v1201_v40  ;;  %v1199_v37 = vmul.f32 1.442695, %v1169_v3  ;;  %v2487_v13 = vadd.s32 (!%p1615_p3), 8, %v2480_v10  ;;  %v2490_v16 = vadd.s32 (!%p1615_p3), 16, %v2480_v10  ;;  %v1311_v63 = vld [vmem:[#allocation7 + $0x28] sm:$0xff] (!%p1615_p3) }
 0x15b   :  { %1213 = vst [vmem:[#allocation7 + $0x50] sm:$0xff] %v1949_v29  ;;  %1962 = vpow2.f32 %v694_v0  ;;  %vm1242_vm4 = vcmp.eq.s32.totalorder (!%p1615_p3), %v2480_v10, %v2482_v11  ;;  %v2493_v1 = vadd.s32 (!%p1615_p3), 24, %v2480_v10  ;;  %v2499_v20 = vadd.s32 (!%p1615_p3), 32, %v2480_v10  ;;  %v1267_v47 = vld [vmem:[#allocation5 + $0x48] sm:$0xff] (!%p1615_p3)  ;;  %v1312_v4 = vld [vmem:[#allocation7 + $0x30] sm:$0xff] (!%p1615_p3)  ;;  %v1313_v0 = vld [vmem:[#allocation7 + $0x38] sm:$0xff] (!%p1615_p3) }
 0x15c   :  { %1964 = vpow2.f32 %v1199_v37  ;;  %v1274_v44 = vsel (!%p1615_p3), %vm1242_vm4, 1.0, %v1258_v55  ;;  %v2502_v12 = vadd.s32 (!%p1615_p3), 40, %v2480_v10  ;;  %v2505_v35 = vadd.s32 (!%p1615_p3), 48, %v2480_v10 }
 0x15d   :  { %1290 = vst [vmem:[#allocation5] sm:$0xff] (!%p1615_p3), %v1274_v44  ;;  %vm1243_vm5 = vcmp.eq.s32.totalorder (!%p1615_p3), %v2487_v13, %v2482_v11  ;;  %vm1244_vm6 = vcmp.eq.s32.totalorder (!%p1615_p3), %v2490_v16, %v2482_v11  ;;  %vm1245_vm7 = vcmp.eq.s32.totalorder (!%p1615_p3), %v2493_v1, %v2482_v11  ;;  %v2514_v18 = vadd.s32 (!%p1615_p3), 56, %v2480_v10  ;;  %v1266_v46 = vld [vmem:[#allocation5 + $0x40] sm:$0xff] (!%p1615_p3) }
 0x15e   :  { %v1951_v26 = vpop.eup %1950  ;;  %v1275_v42 = vsel (!%p1615_p3), %vm1243_vm5, 1.0, %v1259_v14  ;;  %v1276_v22 = vsel (!%p1615_p3), %vm1244_vm6, 1.0, %v1260_v17  ;;  %v1277_v56 = vsel (!%p1615_p3), %vm1245_vm7, 1.0, %v1261_v2  ;;  %vm1246_vm8 = vcmp.eq.s32.totalorder (!%p1615_p3), %v2499_v20, %v2482_v11  ;;  %v1314_v29 = vld [vmem:[#allocation7 + $0x40] sm:$0xff] (!%p1615_p3) }
 0x15f   :  { %v1953_v5 = vpop.eup %1952  ;;  %711 = vst [vmem:[#allocation5 + $0x68] sm:$0xff] %v1951_v26  ;;  %1291 = vst [vmem:[#allocation5 + $0x8] sm:$0xff] (!%p1615_p3), %v1275_v42  ;;  %v1278_v15 = vsel (!%p1615_p3), %vm1246_vm8, 1.0, %v1262_v24  ;;  %vm1247_vm9 = vcmp.eq.s32.totalorder (!%p1615_p3), %v2502_v12, %v2482_v11  ;;  %vm1248_vm10 = vcmp.eq.s32.totalorder (!%p1615_p3), %v2505_v35, %v2482_v11  ;;  %vm1249_vm11 = vcmp.eq.s32.totalorder (!%p1615_p3), %v2514_v18, %v2482_v11  ;;  %v1269_v59 = vld [vmem:[#allocation5 + $0x58] sm:$0xff] (!%p1615_p3)  ;;  %v1315_v26 = vld [vmem:[#allocation7 + $0x48] sm:$0xff] (!%p1615_p3) }
 0x160   :  { %1216 = vst [vmem:[#allocation7 + $0x68] sm:$0xff] %v1953_v5  ;;  %1292 = vst [vmem:[#allocation5 + $0x10] sm:$0xff] (!%p1615_p3), %v1276_v22  ;;  %v1279_v39 = vsel (!%p1615_p3), %vm1247_vm9, 1.0, %v1263_v36  ;;  %v1280_v32 = vsel (!%p1615_p3), %vm1248_vm10, 1.0, %v1264_v31  ;;  %v1281_v52 = vsel (!%p1615_p3), %vm1249_vm11, 1.0, %v1265_v41  ;;  %v2546_v21 = vadd.s32 (!%p1615_p3), 64, %v2480_v10 }
 0x161   :  { %v1955_v6 = vpop.eup %1954  ;;  %1222 = sbr.rel (%p1615_p3) target bundleno = 371 (0x173), region = 37  ;;  %1293 = vst [vmem:[#allocation5 + $0x18] sm:$0xff] (!%p1615_p3), %v1277_v56  ;;  %v1268_v45 = vld [vmem:[#allocation5 + $0x50] sm:$0xff] (!%p1615_p3)  ;;  %1294 = vst [vmem:[#allocation5 + $0x20] sm:$0xff] (!%p1615_p3), %v1278_v15  ;;  %v2549_v27 = vadd.s32 (!%p1615_p3), 72, %v2480_v10  ;;  %v2552_v54 = vadd.s32 (!%p1615_p3), 80, %v2480_v10 }
 0x162   :  { %v1957_v50 = vpop.eup %1956  ;;  %710 = vst [vmem:[#allocation5 + $0x60] sm:$0xff] %v1955_v6  ;;  %1295 = vst [vmem:[#allocation5 + $0x28] sm:$0xff] (!%p1615_p3), %v1279_v39  ;;  %v2555_v57 = vadd.s32 (!%p1615_p3), 88, %v2480_v10  ;;  %v2558_v48 = vadd.s32 (!%p1615_p3), 96, %v2480_v10  ;;  %vm1250_vm12 = vcmp.eq.s32.totalorder (!%p1615_p3), %v2546_v21, %v2482_v11  ;;  %v2563_v51 = vadd.s32 (!%p1615_p3), 104, %v2480_v10  ;;  %v1316_v5 = vld [vmem:[#allocation7 + $0x50] sm:$0xff] (!%p1615_p3) }
 0x163   :  { %1215 = vst [vmem:[#allocation7 + $0x60] sm:$0xff] %v1957_v50  ;;  %v1959_v61 = vpop.eup %1958  ;;  %1296 = vst [vmem:[#allocation5 + $0x30] sm:$0xff] (!%p1615_p3), %v1280_v32  ;;  %v2566_v49 = vadd.s32 (!%p1615_p3), 112, %v2480_v10  ;;  %v2569_v60 = vadd.s32 (!%p1615_p3), 120, %v2480_v10  ;;  %v1282_v19 = vsel (!%p1615_p3), %vm1250_vm12, 1.0, %v1266_v46  ;;  %vm1251_vm13 = vcmp.eq.s32.totalorder (!%p1615_p3), %v2549_v27, %v2482_v11  ;;  %v1317_v6 = vld [vmem:[#allocation7 + $0x58] sm:$0xff] (!%p1615_p3) }
 0x164   :  { %v1961_v7 = vpop.eup %1960  ;;  %713 = vst [vmem:[#allocation5 + $0x78] sm:$0xff] %v1959_v61  ;;  %1297 = vst [vmem:[#allocation5 + $0x38] sm:$0xff] (!%p1615_p3), %v1281_v52  ;;  %vm1252_vm14 = vcmp.eq.s32.totalorder (!%p1615_p3), %v2552_v54, %v2482_v11  ;;  %vm1253_vm15 = vcmp.eq.s32.totalorder (!%p1615_p3), %v2555_v57, %v2482_v11  ;;  %v1283_v38 = vsel (!%p1615_p3), %vm1251_vm13, 1.0, %v1267_v47  ;;  %vm1254_vm0 = vcmp.eq.s32.totalorder (!%p1615_p3), %v2558_v48, %v2482_v11 }
 0x165   :  { %v1963_v8 = vpop.eup %1962  ;;  %1218 = vst [vmem:[#allocation7 + $0x78] sm:$0xff] %v1961_v7  ;;  %1298 = vst [vmem:[#allocation5 + $0x40] sm:$0xff] (!%p1615_p3), %v1282_v19  ;;  %v1284_v40 = vsel (!%p1615_p3), %vm1252_vm14, 1.0, %v1268_v45  ;;  %v1285_v3 = vsel (!%p1615_p3), %vm1253_vm15, 1.0, %v1269_v59  ;;  %vm1255_vm1 = vcmp.eq.s32.totalorder (!%p1615_p3), %v2563_v51, %v2482_v11  ;;  %vm1256_vm2 = vcmp.eq.s32.totalorder (!%p1615_p3), %v2566_v49, %v2482_v11 }
 0x166   :  { %v1965_v9 = vpop.eup %1964  ;;  %712 = vst [vmem:[#allocation5 + $0x70] sm:$0xff] %v1963_v8  ;;  %v1271_v25 = vld [vmem:[#allocation5 + $0x68] sm:$0xff] (!%p1615_p3)  ;;  %1299 = vst [vmem:[#allocation5 + $0x48] sm:$0xff] (!%p1615_p3), %v1283_v38  ;;  %vm1257_vm3 = vcmp.eq.s32.totalorder (!%p1615_p3), %v2569_v60, %v2482_v11  ;;  %v1322_v8 = vsel (!%p1615_p3), %vm1242_vm4, 1.0, %v1306_v23  ;;  %v1323_v55 = vsel (!%p1615_p3), %vm1243_vm5, 1.0, %v1307_v53  ;;  %v1324_v14 = vsel (!%p1615_p3), %vm1244_vm6, 1.0, %v1308_v43 }
 0x167   :  { %1217 = vst [vmem:[#allocation7 + $0x70] sm:$0xff] %v1965_v9  ;;  %1300 = vst [vmem:[#allocation5 + $0x50] sm:$0xff] (!%p1615_p3), %v1284_v40  ;;  %v1287_v50 = vsel (!%p1615_p3), %vm1255_vm1, 1.0, %v1271_v25  ;;  %v1319_v30 = vld [vmem:[#allocation7 + $0x68] sm:$0xff] (!%p1615_p3)  ;;  %v1325_v17 = vsel (!%p1615_p3), %vm1245_vm7, 1.0, %v1309_v62  ;;  %v1326_v10 = vsel (!%p1615_p3), %vm1246_vm8, 1.0, %v1310_v34 }
 0x168   :  { %1301 = vst [vmem:[#allocation5 + $0x58] sm:$0xff] %v1285_v3  ;;  %1303 = vst [vmem:[#allocation5 + $0x68] sm:$0xff] %v1287_v50  ;;  %v1327_v13 = vsel %vm1247_vm9, 1.0, %v1311_v63  ;;  %v1328_v16 = vsel %vm1248_vm10, 1.0, %v1312_v4  ;;  %v1329_v1 = vsel %vm1249_vm11, 1.0, %v1313_v0  ;;  %v1330_v20 = vsel %vm1250_vm12, 1.0, %v1314_v29 }
 0x169   :  { %v1270_v28 = vld [vmem:[#allocation5 + $0x60] sm:$0xff]  ;;  %1338 = vst [vmem:[#allocation7] sm:$0xff] %v1322_v8  ;;  %1339 = vst [vmem:[#allocation7 + $0x8] sm:$0xff] %v1323_v55  ;;  %v1331_v24 = vsel %vm1251_vm13, 1.0, %v1315_v26  ;;  %v1332_v12 = vsel %vm1252_vm14, 1.0, %v1316_v5  ;;  %v1333_v35 = vsel %vm1253_vm15, 1.0, %v1317_v6 }
 0x16a   :  { %v1286_v37 = vsel %vm1254_vm0, 1.0, %v1270_v28  ;;  %v1318_v9 = vld [vmem:[#allocation7 + $0x60] sm:$0xff]  ;;  %1340 = vst [vmem:[#allocation7 + $0x10] sm:$0xff] %v1324_v14  ;;  %1341 = vst [vmem:[#allocation7 + $0x18] sm:$0xff] %v1325_v17  ;;  %v1335_v31 = vsel %vm1255_vm1, 1.0, %v1319_v30 }
 0x16b   :  { %v1273_v58 = vld [vmem:[#allocation5 + $0x78] sm:$0xff]  ;;  %1302 = vst [vmem:[#allocation5 + $0x60] sm:$0xff] %v1286_v37  ;;  %1342 = vst [vmem:[#allocation7 + $0x20] sm:$0xff] %v1326_v10  ;;  %v1334_v36 = vsel %vm1254_vm0, 1.0, %v1318_v9 }
 0x16c   :  { %v1289_v7 = vsel %vm1257_vm3, 1.0, %v1273_v58  ;;  %v1321_v44 = vld [vmem:[#allocation7 + $0x78] sm:$0xff]  ;;  %1343 = vst [vmem:[#allocation7 + $0x28] sm:$0xff] %v1327_v13  ;;  %1344 = vst [vmem:[#allocation7 + $0x30] sm:$0xff] %v1328_v16 }
 0x16d   :  { %v1272_v33 = vld [vmem:[#allocation5 + $0x70] sm:$0xff]  ;;  %1305 = vst [vmem:[#allocation5 + $0x78] sm:$0xff] %v1289_v7  ;;  %1345 = vst [vmem:[#allocation7 + $0x38] sm:$0xff] %v1329_v1  ;;  %v1337_v41 = vsel %vm1257_vm3, 1.0, %v1321_v44 }
 0x16e   :  { %v1288_v61 = vsel %vm1256_vm2, 1.0, %v1272_v33  ;;  %v1320_v2 = vld [vmem:[#allocation7 + $0x70] sm:$0xff]  ;;  %1346 = vst [vmem:[#allocation7 + $0x40] sm:$0xff] %v1330_v20  ;;  %1347 = vst [vmem:[#allocation7 + $0x48] sm:$0xff] %v1331_v24 }
 0x16f   :  { %1304 = vst [vmem:[#allocation5 + $0x70] sm:$0xff] %v1288_v61  ;;  %1348 = vst [vmem:[#allocation7 + $0x50] sm:$0xff] %v1332_v12  ;;  %v1336_v18 = vsel %vm1256_vm2, 1.0, %v1320_v2 }
 0x170   :  { %1349 = vst [vmem:[#allocation7 + $0x58] sm:$0xff] %v1333_v35  ;;  %1350 = vst [vmem:[#allocation7 + $0x60] sm:$0xff] %v1334_v36 }
 0x171   :  { %1351 = vst [vmem:[#allocation7 + $0x68] sm:$0xff] %v1335_v31  ;;  %1352 = vst [vmem:[#allocation7 + $0x70] sm:$0xff] %v1336_v18 }
 0x172   :  { %1353 = vst [vmem:[#allocation7 + $0x78] sm:$0xff] %v1337_v41 }
 0x173 PF:  { %v1354_v42 = vld [vmem:[#allocation5] sm:$0xff]  ;;  %v1355_v56 = vld [vmem:[#allocation5 + $0x8] sm:$0xff]  ;;  %v1356_v47 = vld [vmem:[#allocation5 + $0x10] sm:$0xff]  ;;  %s2657_s7 = sld [smem:[#allocation3]]  ;;  %s2043_s25 = smov [#allocation7]  }
 0x174   :  { %v1370_v22 = vld [vmem:[#allocation7] sm:$0xff]  ;;  %v1371_v46 = vld [vmem:[#allocation7 + $0x8] sm:$0xff]  ;;  %v1372_v45 = vld [vmem:[#allocation7 + $0x10] sm:$0xff]  ;;  %s2659_s9 = sld [smem:[#allocation4]]  ;;  %s1447_s26 = sshll.u32 %s2043_s25, 4  ;;  %s2662_s26 = int_to_ptr.vmem [resolvable:$true] %s1447_s26 }
 0x175   :  { %v1386_v15 = vmul.f32 %v1370_v22, %v1354_v42  ;;  %v1387_v39 = vmul.f32 %v1371_v46, %v1355_v56  ;;  %v1388_v32 = vmul.f32 %v1372_v45, %v1356_v47  ;;  %v1357_v52 = vld [vmem:[#allocation5 + $0x18] sm:$0xff]  ;;  %v1358_v59 = vld [vmem:[#allocation5 + $0x20] sm:$0xff]  ;;  %v1359_v27 = vld [vmem:[#allocation5 + $0x28] sm:$0xff]  ;;  %s2044_s30 = smov [#allocation5]   ;;  %s2045_s14 = smov [#allocation9]  }
 0x176   :  { %v1373_v21 = vld [vmem:[#allocation7 + $0x18] sm:$0xff]  ;;  %v1374_v28 = vld [vmem:[#allocation7 + $0x20] sm:$0xff]  ;;  %v1375_v54 = vld [vmem:[#allocation7 + $0x28] sm:$0xff]  ;;  %s1429_s13 = sshll.u32 %s2044_s30, 4  ;;  %s1465_s15 = sshll.u32 %s2045_s14, 4  ;;  %s2665_s13 = int_to_ptr.vmem [resolvable:$true] %s1429_s13  ;;  %s2669_s15 = int_to_ptr.vmem [resolvable:$true] %s1465_s15 }
 0x177   :  { %1402 = vst [vmem:[#allocation9] sm:$0xff] %v1386_v15  ;;  %v1389_v11 = vmul.f32 %v1373_v21, %v1357_v52  ;;  %1403 = vst [vmem:[#allocation9 + $0x8] sm:$0xff] %v1387_v39  ;;  %v1390_v57 = vmul.f32 %v1374_v28, %v1358_v59  ;;  %v1391_v48 = vmul.f32 %v1375_v54, %v1359_v27  ;;  %v1360_v25 = vld [vmem:[#allocation5 + $0x30] sm:$0xff]  ;;  %v1361_v58 = vld [vmem:[#allocation5 + $0x38] sm:$0xff]  ;;  %s1966_s23 = scalar_lea.vmem %s2662_s26, 2048  ;;  %p1971_p5 = scmp.lt.s32.totalorder %s2662_s26, %s2662_s26 }
 0x178   :  { %1404 = vst [vmem:[#allocation9 + $0x10] sm:$0xff] %v1388_v32  ;;  %v1376_v33 = vld [vmem:[#allocation7 + $0x30] sm:$0xff]  ;;  %v1377_v49 = vld [vmem:[#allocation7 + $0x38] sm:$0xff]  ;;  %v1362_v60 = vld [vmem:[#allocation5 + $0x40] sm:$0xff]  ;;  %p1967_p4 = scmp.ne.s32.totalorder %s2662_s26, %s1966_s23  ;;  %p1972_p6 = scmp.lt.s32.totalorder %s1966_s23, %s1966_s23 }
 0x179   :  { %1405 = vst [vmem:[#allocation9 + $0x18] sm:$0xff] %v1389_v11  ;;  %v1392_v51 = vmul.f32 %v1376_v33, %v1360_v25  ;;  %v1378_v23 = vld [vmem:[#allocation7 + $0x40] sm:$0xff]  ;;  %1406 = vst [vmem:[#allocation9 + $0x20] sm:$0xff] %v1390_v57  ;;  %v1393_v53 = vmul.f32 %v1377_v49, %v1361_v58  ;;  %v1363_v19 = vld [vmem:[#allocation5 + $0x48] sm:$0xff]  ;;  %s1618_s3 = sshll.u32 %s2657_s7, 4 }
 0x17a   :  { %1407 = vst [vmem:[#allocation9 + $0x28] sm:$0xff] %v1391_v48  ;;  %v1394_v43 = vmul.f32 %v1378_v23, %v1362_v60  ;;  %v1379_v62 = vld [vmem:[#allocation7 + $0x48] sm:$0xff]  ;;  %v1364_v34 = vld [vmem:[#allocation5 + $0x50] sm:$0xff]  ;;  %v1365_v40 = vld [vmem:[#allocation5 + $0x58] sm:$0xff]  ;;  %s1444_s5 = sadd.s32 %s1618_s3, %s2659_s9  ;;  %p1973_p7 = por %p1972_p6, %p1971_p5 }
 0x17b   :  { %1408 = vst [vmem:[#allocation9 + $0x30] sm:$0xff] %v1392_v51  ;;  %v1395_v63 = vmul.f32 %v1379_v62, %v1363_v19  ;;  %v1380_v38 = vld [vmem:[#allocation7 + $0x50] sm:$0xff]  ;;  %v1381_v3 = vld [vmem:[#allocation7 + $0x58] sm:$0xff]  ;;  %1409 = vst [vmem:[#allocation9 + $0x38] sm:$0xff] %v1393_v53  ;;  %s2667_s16 = sshll.u32 %s1444_s5, 7 }
 0x17c   :  { %1410 = vst [vmem:[#allocation9 + $0x40] sm:$0xff] %v1394_v43  ;;  %v1396_v4 = vmul.f32 %v1380_v38, %v1364_v34  ;;  %v1397_v0 = vmul.f32 %v1381_v3, %v1365_v40  ;;  %v1366_v29 = vld [vmem:[#allocation5 + $0x60] sm:$0xff]  ;;  %v1367_v26 = vld [vmem:[#allocation5 + $0x68] sm:$0xff]  ;;  %v1368_v50 = vld [vmem:[#allocation5 + $0x70] sm:$0xff]  ;;  %s1446_s19 = scalar_lea.hbm %s2743_s11, %s2667_s16  ;;  %s2679_s22 = scalar_lea.hbm %s2742_s10, %s2667_s16 }
 0x17d   :  { %v1382_v37 = vld [vmem:[#allocation7 + $0x60] sm:$0xff]  ;;  %1411 = vst [vmem:[#allocation9 + $0x48] sm:$0xff] %v1395_v63  ;;  %v1383_v6 = vld [vmem:[#allocation7 + $0x68] sm:$0xff]  ;;  %v1384_v61 = vld [vmem:[#allocation7 + $0x70] sm:$0xff]  ;;  %p1974_p8 = pnand %p1973_p7, %p1967_p4 }
 0x17e   :  { %v1398_v5 = vmul.f32 %v1382_v37, %v1366_v29  ;;  %1412 = vst [vmem:[#allocation9 + $0x50] sm:$0xff] %v1396_v4  ;;  %1413 = vst [vmem:[#allocation9 + $0x58] sm:$0xff] %v1397_v0  ;;  %v1399_v7 = vmul.f32 %v1383_v6, %v1367_v26  ;;  %v1400_v8 = vmul.f32 %v1384_v61, %v1368_v50  ;;  %v1369_v9 = vld [vmem:[#allocation5 + $0x78] sm:$0xff] }
 0x17f   :  { %v1385_v30 = vld [vmem:[#allocation7 + $0x78] sm:$0xff] }
 0x180   :  { %1414 = vst [vmem:[#allocation9 + $0x60] sm:$0xff] %v1398_v5  ;;  %v1401_v55 = vmul.f32 %v1385_v30, %v1369_v9 }
 0x181   :  { %1977 = shalt.err (!%p1974_p8)
}
 0x182   :  { %s1978_s2 = scalar_lea.hbm %s1446_s19, 2048  ;;  %s1980_s8 = scalar_lea.hbm %s2743_s11, 2048 }
 0x183   :  { %p1979_p9 = scmp.ne.s32.totalorder %s1446_s19, %s1978_s2  ;;  %p1981_p10 = scmp.lt.u32.totalorder %s1446_s19, %s2743_s11 }
 0x184   :  { %p1982_p11 = scmp.lt.u32.totalorder %s1980_s8, %s1978_s2  ;;  %p1984_p13 = scmp.lt.u32.totalorder %s1978_s2, %s1446_s19 }
 0x186   :  { %p1983_p12 = por %p1982_p11, %p1981_p10 }
 0x188   :  { %p1985_p0 = por %p1984_p13, %p1983_p12 }
 0x18a   :  { %p1986_p1 = pnand %p1985_p0, %p1979_p9 }
 0x18c   :  { %1989 = shalt.err (!%p1986_p1)
}
 0x18d   :  { %s2046_s28 = smov 128   ;;  %s2047_s0 = smov 8   ;;  %1415 = vst [vmem:[#allocation9 + $0x68] sm:$0xff] %v1399_v7  ;;  %1416 = vst [vmem:[#allocation9 + $0x70] sm:$0xff] %v1400_v8 }
 0x18e   :  { %1453 = dma.vmem_to_hbm [thread:$0]  %s2662_s26, 2048, %s1446_s19, [#allocation8], %s2046_s28, %s2046_s28, %s2047_s0  }
 0x18f   :  { %s1990_s1 = scalar_lea.vmem %s2665_s13, 2048  ;;  %p1995_p3 = scmp.lt.s32.totalorder %s2665_s13, %s2665_s13 }
 0x190   :  { %p1991_p2 = scmp.ne.s32.totalorder %s2665_s13, %s1990_s1  ;;  %p1996_p4 = scmp.lt.s32.totalorder %s1990_s1, %s1990_s1 }
 0x192   :  { %p1997_p5 = por %p1996_p4, %p1995_p3 }
 0x194   :  { %p1998_p6 = pnand %p1997_p5, %p1991_p2 }
 0x196   :  { %2001 = shalt.err (!%p1998_p6)
}
 0x197   :  { %s2002_s11 = scalar_lea.hbm %s2679_s22, 2048  ;;  %s2004_s9 = scalar_lea.hbm %s2742_s10, 2048 }
 0x198   :  { %p2003_p7 = scmp.ne.s32.totalorder %s2679_s22, %s2002_s11  ;;  %p2005_p8 = scmp.lt.u32.totalorder %s2679_s22, %s2742_s10 }
 0x199   :  { %p2006_p9 = scmp.lt.u32.totalorder %s2004_s9, %s2002_s11  ;;  %p2008_p11 = scmp.lt.u32.totalorder %s2002_s11, %s2679_s22 }
 0x19b   :  { %p2007_p10 = por %p2006_p9, %p2005_p8 }
 0x19d   :  { %p2009_p12 = por %p2008_p11, %p2007_p10 }
 0x19f   :  { %p2010_p13 = pnand %p2009_p12, %p2003_p7 }
 0x1a1   :  { %2013 = shalt.err (!%p2010_p13)
}
 0x1a2   :  { %1435 = dma.vmem_to_hbm [thread:$0]  %s2665_s13, 2048, %s2679_s22, [#allocation6], %s2046_s28, %s2046_s28, %s2047_s0   ;;  %1417 = vst [vmem:[#allocation9 + $0x78] sm:$0xff] %v1401_v55 }
 0x1a3   :  { %s1464_s10 = scalar_lea.hbm %s2744_s12, %s2667_s16  ;;  %s2014_s3 = scalar_lea.vmem %s2669_s15, 2048 }
 0x1a4   :  { %p2015_p0 = scmp.ne.s32.totalorder %s2669_s15, %s2014_s3  ;;  %p2019_p1 = scmp.lt.s32.totalorder %s2669_s15, %s2669_s15 }
 0x1a5   :  { %p2020_p2 = scmp.lt.s32.totalorder %s2014_s3, %s2014_s3 }
 0x1a7   :  { %p2021_p3 = por %p2020_p2, %p2019_p1 }
 0x1a9   :  { %p2022_p4 = pnand %p2021_p3, %p2015_p0 }
 0x1ab   :  { %2025 = shalt.err (!%p2022_p4)
}
 0x1ac   :  { %s2026_s5 = scalar_lea.hbm %s1464_s10, 2048  ;;  %s2028_s19 = scalar_lea.hbm %s2744_s12, 2048 }
 0x1ad   :  { %p2027_p5 = scmp.ne.s32.totalorder %s1464_s10, %s2026_s5  ;;  %p2029_p6 = scmp.lt.u32.totalorder %s1464_s10, %s2744_s12 }
 0x1ae   :  { %p2030_p7 = scmp.lt.u32.totalorder %s2028_s19, %s2026_s5  ;;  %p2032_p9 = scmp.lt.u32.totalorder %s2026_s5, %s1464_s10 }
 0x1b0   :  { %p2031_p8 = por %p2030_p7, %p2029_p6 }
 0x1b2   :  { %p2033_p10 = por %p2032_p9, %p2031_p8 }
 0x1b4   :  { %p2034_p11 = pnand %p2033_p10, %p2027_p5 }
 0x1b6   :  { %2037 = shalt.err (!%p2034_p11)
}
 0x1b7   :  { %1471 = dma.vmem_to_hbm [thread:$0]  %s2669_s15, 2048, %s1464_s10, [#allocation8], %s2046_s28, %s2046_s28, %s2047_s0  }
 0x1b8   :  { %2038 = dma.done.wait [#allocation6], 2048  }
 0x1b9   :  { %2039 = vsyncadd [#allocation6], 4294965248 }
 0x1ba   :  { %2040 = dma.done.wait [#allocation8], 4096  }
 0x1bb   :  { %2041 = vsyncadd [#allocation8], 4294963200 }
 0x1bc   :  { %1481 = vsyncpa [#allocation6], 1 }
 0x1bd   :  { %1482 = vsyncpa [#allocation8], 1 }

</bundles_post_ra>
